<compile_context>
chip_gen: v7x
topology: tpu7x:2x2x1
jax: 0.10.0
libtpu: 0.0.40
codegen_flags: <defaults>
</compile_context>

<pallas_src>
import numpy as np
import jax
import jax.numpy as jnp
from jax import lax
from jax.experimental import pallas as pl
from jax.experimental.pallas import tpu as pltpu

HIDDEN = 32   # hidden_size / d_model
NHEAD = 8
HEAD_DIM = HIDDEN // NHEAD
FFN = 128
LN_EPS = 1e-5


# ------------------------------------------------------------------ pallas_call helper
def _vmem():
    return pl.BlockSpec(memory_space=pltpu.MemorySpace.VMEM)


def run_kernel(kernel, out_shape, args):
    """Single-invocation pallas_call: every operand lives fully in VMEM (working set << 1 MiB)."""
    return pl.pallas_call(
        kernel,
        out_shape=out_shape,
        in_specs=[_vmem() for _ in args],
        out_specs=_vmem(),
    )(*args)


def _sigmoid(x):
    # manual form; exp/div are guaranteed Mosaic-supported elementwise ops
    return 1.0 / (1.0 + jnp.exp(-x))


# ------------------------------------------------------------------ LSTM branch kernel
def make_lstm_branch_kernel(bsz, seq_len, hidden):
    """(input_proj folded in) + single-layer batch-first LSTM; returns last hidden state (B, H)."""
    H = hidden

    def kernel(x_ref, wf_ref, bf_ref, whh_ref, o_ref):
        # fused (input_proj @ W_ih) matmul for ALL timesteps at once: (B*L, 4H); 4H = 128 lanes
        xg = jnp.dot(x_ref[...], wf_ref[...], preferred_element_type=jnp.float32) + bf_ref[...]
        xg3 = xg.reshape(bsz, seq_len, 4 * H)            # tile-aligned leading-dim split
        whh = whh_ref[...]
        h = jnp.zeros((bsz, H), jnp.float32)
        c = jnp.zeros((bsz, H), jnp.float32)
        # recurrence is a strictly serial dependence chain; static unroll keeps scheduler visibility
        for t in range(seq_len):
            g = xg3[:, t, :] + jnp.dot(h, whh, preferred_element_type=jnp.float32)
            sg = _sigmoid(g)                             # ONE full-width EUP pass covers i, f, o
            i_g = sg[:, 0:H]                             # gate columns reordered (i, f, o, g) at init
            f_g = sg[:, H:2 * H]
            o_g = sg[:, 2 * H:3 * H]
            g_g = jnp.tanh(g[:, 3 * H:4 * H])
            c = f_g * c + i_g * g_g
            h = o_g * jnp.tanh(c)
        o_ref[...] = h.astype(o_ref.dtype)               # out[:, -1, :] == h_T

    return kernel


# ------------------------------------------------------------------ Transformer branch kernel
def make_transformer_branch_kernel(bsz, seq_len, din, d_model, nhead):
    """input_proj + positional encoding + one post-norm TransformerEncoderLayer (ReLU FFN),
    evaluated for the last token only downstream of K/V."""
    n = bsz * seq_len

    def layer_norm(x, g, b):
        m = jnp.mean(x, axis=-1, keepdims=True)
        v = jnp.mean((x - m) ** 2, axis=-1, keepdims=True)
        return (x - m) * lax.rsqrt(v + LN_EPS) * g + b

    def kernel(x_ref, wkv_ref, bkv_ref, wlq_ref, blq_ref,
               hsum_ref, hexp_ref, wo_ref, bo_ref,
               g1_ref, be1_ref, w1_ref, b1_ref, w2_ref, b2_ref, g2_ref, be2_ref,
               o_ref):
        x = x_ref[...]                                                    # (B*L, Din)
        # full-length K|V in ONE fused matmul; input_proj + PE + biases folded in at init
        kv = jnp.dot(x, wkv_ref[...], preferred_element_type=jnp.float32)
        kv3 = kv.reshape(bsz, seq_len, 2 * d_model) + bkv_ref[...]        # (B, L, 2D)
        k3 = kv3[:, :, :d_model]
        v3 = kv3[:, :, d_model:]
        # ---- everything below only needs the LAST time step ----
        x_last = x.reshape(bsz, seq_len, din)[:, seq_len - 1, :]          # (B, Din)
        lq = jnp.dot(x_last, wlq_ref[...], preferred_element_type=jnp.float32) + blq_ref[...]
        x2_last = lq[:, :d_model]                # projected + PE residual row   (B, D)
        q_last = lq[:, d_model:]                 # query row, 1/sqrt(hd) pre-folded
        # attention scores for the single query: lane-dense mul + head-sum matmul (no tiny slices)
        prod = (q_last[:, None, :] * k3).reshape(n, d_model)              # (B*L, D)
        s = jnp.dot(prod, hsum_ref[...], preferred_element_type=jnp.float32)
        s = s.reshape(bsz, seq_len, nhead)                                # (B, L, nhead)
        s = s - jnp.max(s, axis=1, keepdims=True)
        p = jnp.exp(s)
        p = p / jnp.sum(p, axis=1, keepdims=True)                         # exact softmax
        # weighted V sum: expand per-head probs back to head lanes, multiply, reduce over keys
        p_wide = jnp.dot(p.reshape(n, nhead), hexp_ref[...],
                         preferred_element_type=jnp.float32)              # (B*L, D)
        o_heads = (p_wide * v3.reshape(n, d_model)).reshape(bsz, seq_len, d_model).sum(axis=1)
        attn = jnp.dot(o_heads, wo_ref[...], preferred_element_type=jnp.float32) + bo_ref[...]
        # post-norm encoder layer (PyTorch default norm_first=False, activation=relu), (B, D) rows
        y = layer_norm(x2_last + attn, g1_ref[...], be1_ref[...])
        f = jnp.maximum(
            jnp.dot(y, w1_ref[...], preferred_element_type=jnp.float32) + b1_ref[...], 0.0)
        f = jnp.dot(f, w2_ref[...], preferred_element_type=jnp.float32) + b2_ref[...]
        o_ref[...] = layer_norm(y + f, g2_ref[...], be2_ref[...]).astype(o_ref.dtype)

    return kernel


# ------------------------------------------------------------------ parameters
class _KeyGen:
    def __init__(self, key):
        self._key = key

    def __call__(self):
        self._key, k = jax.random.split(self._key)
        return k


def _uniform(key, shape, fan_in):
    s = 1.0 / np.sqrt(fan_in)
    return jax.random.uniform(key, shape, jnp.float32, -s, s)


def positional_encoding(seq_len, d_model):
    pos = np.arange(seq_len, dtype=np.float32)[:, None]
    div = np.exp(np.arange(0, d_model, 2, dtype=np.float32) * (-np.log(10000.0) / d_model))
    pe = np.zeros((seq_len, d_model), np.float32)
    pe[:, 0::2] = np.sin(pos * div)
    pe[:, 1::2] = np.cos(pos * div)
    return jnp.asarray(pe)                                   # (L, D)


def init_params(key, input_size, hidden, seq_len):
    """Raw parameters matching the PyTorch module's parameterization (column-major weights)."""
    kg = _KeyGen(key)
    lstm = {
        'Wproj': _uniform(kg(), (input_size, hidden), input_size),
        'bproj': _uniform(kg(), (1, hidden), input_size),
        'Wih': _uniform(kg(), (hidden, 4 * hidden), hidden),   # columns in PyTorch order i|f|g|o
        'Whh': _uniform(kg(), (hidden, 4 * hidden), hidden),
        'b_ih': _uniform(kg(), (1, 4 * hidden), hidden),
        'b_hh': _uniform(kg(), (1, 4 * hidden), hidden),
    }
    trans = {
        'Wproj': _uniform(kg(), (input_size, hidden), input_size),
        'bproj': _uniform(kg(), (1, hidden), input_size),
        'pe': positional_encoding(seq_len, hidden),
        'Wq': _uniform(kg(), (hidden, hidden), hidden), 'bq': _uniform(kg(), (1, hidden), hidden),
        'Wk': _uniform(kg(), (hidden, hidden), hidden), 'bk': _uniform(kg(), (1, hidden), hidden),
        'Wv': _uniform(kg(), (hidden, hidden), hidden), 'bv': _uniform(kg(), (1, hidden), hidden),
        'Wo': _uniform(kg(), (hidden, hidden), hidden), 'bo': _uniform(kg(), (1, hidden), hidden),
        'g1': jnp.ones((1, hidden), jnp.float32), 'be1': jnp.zeros((1, hidden), jnp.float32),
        'W1': _uniform(kg(), (hidden, FFN), hidden), 'b1': _uniform(kg(), (1, FFN), hidden),
        'W2': _uniform(kg(), (FFN, hidden), FFN), 'b2': _uniform(kg(), (1, hidden), FFN),
        'g2': jnp.ones((1, hidden), jnp.float32), 'be2': jnp.zeros((1, hidden), jnp.float32),
    }
    return {'lstm': lstm, 'trans': trans}


# -------- init-time (exact) folding of linear-into-linear, PE, scale and gate reordering --------
def prepare_lstm_params(p, hidden):
    H = hidden
    # reorder gate columns (i, f, g, o) -> (i, f, o, g): sigmoid gates become lane-contiguous
    idx = np.concatenate([np.arange(0, 2 * H), np.arange(3 * H, 4 * H), np.arange(2 * H, 3 * H)])
    wih = p['Wih'][:, idx]
    whh = p['Whh'][:, idx]
    b = (p['b_ih'] + p['b_hh'])[:, idx]
    return {
        'Wf': p['Wproj'] @ wih,                   # input_proj folded into input-to-gate weights
        'bf': p['bproj'] @ wih + b,
        'Whh': whh,
    }


def prepare_transformer_params(p, hidden, nhead):
    D, hd = hidden, hidden // nhead
    scale = 1.0 / np.sqrt(hd)
    pe_b = p['pe'] + p['bproj']                                   # (L, D): PE + input_proj bias
    wkv = jnp.concatenate([p['Wk'], p['Wv']], axis=1)             # (D, 2D)
    bkv = jnp.concatenate([p['bk'], p['bv']], axis=1)             # (1, 2D)
    wq_s, bq_s = p['Wq'] * scale, p['bq'] * scale                 # fold 1/sqrt(hd) into Q proj
    # head-sum (D, nhead) / head-expand (nhead, D) block-"identity" matrices
    hsum = (np.arange(D)[:, None] // hd == np.arange(nhead)[None, :]).astype(np.float32)
    return {
        'Wkv': p['Wproj'] @ wkv,                                  # input_proj folded into K/V proj
        'bkv': pe_b @ wkv + bkv,                                  # per-position K/V bias incl. PE
        'Wlq': jnp.concatenate([p['Wproj'], p['Wproj'] @ wq_s], axis=1),    # last row: [x2 | q]
        'blq': jnp.concatenate([pe_b[-1:], pe_b[-1:] @ wq_s + bq_s], axis=1),
        'hsum': jnp.asarray(hsum),
        'hexp': jnp.asarray(hsum.T),
        'Wo': p['Wo'], 'bo': p['bo'],
        'g1': p['g1'], 'be1': p['be1'], 'W1': p['W1'], 'b1': p['b1'],
        'W2': p['W2'], 'b2': p['b2'], 'g2': p['g2'], 'be2': p['be2'],
    }


# ------------------------------------------------------------------ forward pass
def feature_branch_forward(x, prepared, branch_type):
    """x: (B, L, input_size), batch_first — matches FeatureBranch.forward."""
    bsz, seq_len, din = x.shape
    x2 = x.reshape(bsz * seq_len, din).astype(jnp.float32)       # flat rows; view-only reshape

    if branch_type == 'LSTM':
        p = prepared['lstm']
        return run_kernel(
            make_lstm_branch_kernel(bsz, seq_len, HIDDEN),
            jax.ShapeDtypeStruct((bsz, HIDDEN), jnp.float32),
            (x2, p['Wf'], p['bf'], p['Whh']))
    elif branch_type == 'Transformer':
        p = prepared['trans']
        return run_kernel(
            make_transformer_branch_kernel(bsz, seq_len, din, HIDDEN, NHEAD),
            jax.ShapeDtypeStruct((bsz, HIDDEN), jnp.float32),
            (x2, p['Wkv'], p['bkv'], p['Wlq'], p['blq'], p['hsum'], p['hexp'],
             p['Wo'], p['bo'], p['g1'], p['be1'], p['W1'], p['b1'],
             p['W2'], p['b2'], p['g2'], p['be2']))
    else:
        raise ValueError(f"unknown branch_type: {branch_type}")


# ------------------------------------------------------------------ main
if __name__ == "__main__":
    B, L, DIN = 2, 16, 8                                          # batch=2, seq=16, input_size=8, hidden=32
    root = jax.random.PRNGKey(0)
    k_params, k_x = jax.random.split(root)
    raw = init_params(k_params, DIN, HIDDEN, seq_len=L)
    prepared = {
        'lstm': prepare_lstm_params(raw['lstm'], HIDDEN),
        'trans': prepare_transformer_params(raw['trans'], HIDDEN, NHEAD),
    }

    x = jax.random.normal(k_x, (B, L, DIN), jnp.float32)          # batch_first (B, L, input_size)

    out_lstm = feature_branch_forward(x, prepared, 'LSTM')
    out_tr = feature_branch_forward(x, prepared, 'Transformer')
    out_lstm, out_tr = jax.block_until_ready((out_lstm, out_tr))

    assert out_lstm.shape == (B, HIDDEN) and out_lstm.dtype == jnp.float32
    assert out_tr.shape == (B, HIDDEN) and out_tr.dtype == jnp.float32
    assert bool(jnp.all(jnp.isfinite(out_lstm))) and bool(jnp.all(jnp.isfinite(out_tr)))
    print("KERNEL_OK")
</pallas_src>

<mosaic_0001>
module attributes {stable_mosaic.version = 11 : i64} {
  func.func @kernel(%arg0: memref<32x8xf32, #tpu.memory_space<vmem>>, %arg1: memref<8x128xf32, #tpu.memory_space<vmem>>, %arg2: memref<1x128xf32, #tpu.memory_space<vmem>>, %arg3: memref<32x128xf32, #tpu.memory_space<vmem>>, %arg4: memref<2x32xf32, #tpu.memory_space<vmem>>) attributes {dimension_semantics = [], scalar_prefetch = 0 : i64, scratch_operands = 0 : i64, tpu.core_type = #tpu.core_type<tc>} {
    %c0 = arith.constant 0 : index
    %c0_0 = arith.constant 0 : index
    %0 = vector.load %arg0[%c0, %c0_0] : memref<32x8xf32, #tpu.memory_space<vmem>>, vector<32x8xf32>
    %c0_1 = arith.constant 0 : index
    %c0_2 = arith.constant 0 : index
    %1 = vector.load %arg1[%c0_1, %c0_2] : memref<8x128xf32, #tpu.memory_space<vmem>>, vector<8x128xf32>
    %cst = arith.constant dense<0.000000e+00> : vector<32x128xf32>
    %2 = tpu.matmul %0, %1, %cst {dimension_numbers = #tpu.dot_dimension_numbers<[1], [0], [0], [1], [0, 0, 1, 1], [], []>} : vector<32x8xf32>, vector<8x128xf32>, vector<32x128xf32> -> vector<32x128xf32>
    %c0_3 = arith.constant 0 : index
    %c0_4 = arith.constant 0 : index
    %3 = vector.load %arg2[%c0_3, %c0_4] : memref<1x128xf32, #tpu.memory_space<vmem>>, vector<1x128xf32>
    %4 = vector.broadcast %3 : vector<1x128xf32> to vector<32x128xf32>
    %5 = arith.addf %2, %4 : vector<32x128xf32>
    %6 = vector.shape_cast %5 : vector<32x128xf32> to vector<2x16x128xf32>
    %c0_5 = arith.constant 0 : index
    %c0_6 = arith.constant 0 : index
    %7 = vector.load %arg3[%c0_5, %c0_6] : memref<32x128xf32, #tpu.memory_space<vmem>>, vector<32x128xf32>
    %cst_7 = arith.constant 0.000000e+00 : f32
    %8 = vector.broadcast %cst_7 : f32 to vector<2x32xf32>
    %cst_8 = arith.constant 0.000000e+00 : f32
    %9 = vector.broadcast %cst_8 : f32 to vector<2x32xf32>
    %10 = vector.extract_strided_slice %6 {offsets = [0, 0, 0], sizes = [2, 1, 128], strides = [1, 1, 1]} : vector<2x16x128xf32> to vector<2x1x128xf32>
    %11 = vector.shape_cast %10 : vector<2x1x128xf32> to vector<2x128xf32>
    %cst_9 = arith.constant dense<0.000000e+00> : vector<2x128xf32>
    %12 = tpu.matmul %8, %7, %cst_9 {dimension_numbers = #tpu.dot_dimension_numbers<[1], [0], [0], [1], [0, 0, 1, 1], [], []>} : vector<2x32xf32>, vector<32x128xf32>, vector<2x128xf32> -> vector<2x128xf32>
    %13 = arith.addf %11, %12 : vector<2x128xf32>
    %cst_10 = arith.constant 0.000000e+00 : f32
    %14 = vector.broadcast %cst_10 : f32 to vector<2x128xf32>
    %15 = arith.subf %14, %13 : vector<2x128xf32>
    %16 = math.exp %15 : vector<2x128xf32>
    %cst_11 = arith.constant 1.000000e+00 : f32
    %17 = vector.broadcast %cst_11 : f32 to vector<2x128xf32>
    %18 = arith.addf %17, %16 : vector<2x128xf32>
    %cst_12 = arith.constant 1.000000e+00 : f32
    %19 = vector.broadcast %cst_12 : f32 to vector<2x128xf32>
    %20 = arith.divf %19, %18 : vector<2x128xf32>
    %21 = vector.extract_strided_slice %20 {offsets = [0, 0], sizes = [2, 32], strides = [1, 1]} : vector<2x128xf32> to vector<2x32xf32>
    %22 = vector.extract_strided_slice %20 {offsets = [0, 32], sizes = [2, 32], strides = [1, 1]} : vector<2x128xf32> to vector<2x32xf32>
    %23 = vector.extract_strided_slice %20 {offsets = [0, 64], sizes = [2, 32], strides = [1, 1]} : vector<2x128xf32> to vector<2x32xf32>
    %24 = vector.extract_strided_slice %13 {offsets = [0, 96], sizes = [2, 32], strides = [1, 1]} : vector<2x128xf32> to vector<2x32xf32>
    %25 = math.tanh %24 : vector<2x32xf32>
    %26 = arith.mulf %22, %9 : vector<2x32xf32>
    %27 = arith.mulf %21, %25 : vector<2x32xf32>
    %28 = arith.addf %26, %27 : vector<2x32xf32>
    %29 = math.tanh %28 : vector<2x32xf32>
    %30 = arith.mulf %23, %29 : vector<2x32xf32>
    %31 = vector.extract_strided_slice %6 {offsets = [0, 1, 0], sizes = [2, 1, 128], strides = [1, 1, 1]} : vector<2x16x128xf32> to vector<2x1x128xf32>
    %32 = vector.shape_cast %31 : vector<2x1x128xf32> to vector<2x128xf32>
    %cst_13 = arith.constant dense<0.000000e+00> : vector<2x128xf32>
    %33 = tpu.matmul %30, %7, %cst_13 {dimension_numbers = #tpu.dot_dimension_numbers<[1], [0], [0], [1], [0, 0, 1, 1], [], []>} : vector<2x32xf32>, vector<32x128xf32>, vector<2x128xf32> -> vector<2x128xf32>
    %34 = arith.addf %32, %33 : vector<2x128xf32>
    %cst_14 = arith.constant 0.000000e+00 : f32
    %35 = vector.broadcast %cst_14 : f32 to vector<2x128xf32>
    %36 = arith.subf %35, %34 : vector<2x128xf32>
    %37 = math.exp %36 : vector<2x128xf32>
    %cst_15 = arith.constant 1.000000e+00 : f32
    %38 = vector.broadcast %cst_15 : f32 to vector<2x128xf32>
    %39 = arith.addf %38, %37 : vector<2x128xf32>
    %cst_16 = arith.constant 1.000000e+00 : f32
    %40 = vector.broadcast %cst_16 : f32 to vector<2x128xf32>
    %41 = arith.divf %40, %39 : vector<2x128xf32>
    %42 = vector.extract_strided_slice %41 {offsets = [0, 0], sizes = [2, 32], strides = [1, 1]} : vector<2x128xf32> to vector<2x32xf32>
    %43 = vector.extract_strided_slice %41 {offsets = [0, 32], sizes = [2, 32], strides = [1, 1]} : vector<2x128xf32> to vector<2x32xf32>
    %44 = vector.extract_strided_slice %41 {offsets = [0, 64], sizes = [2, 32], strides = [1, 1]} : vector<2x128xf32> to vector<2x32xf32>
    %45 = vector.extract_strided_slice %34 {offsets = [0, 96], sizes = [2, 32], strides = [1, 1]} : vector<2x128xf32> to vector<2x32xf32>
    %46 = math.tanh %45 : vector<2x32xf32>
    %47 = arith.mulf %43, %28 : vector<2x32xf32>
    %48 = arith.mulf %42, %46 : vector<2x32xf32>
    %49 = arith.addf %47, %48 : vector<2x32xf32>
    %50 = math.tanh %49 : vector<2x32xf32>
    %51 = arith.mulf %44, %50 : vector<2x32xf32>
    %52 = vector.extract_strided_slice %6 {offsets = [0, 2, 0], sizes = [2, 1, 128], strides = [1, 1, 1]} : vector<2x16x128xf32> to vector<2x1x128xf32>
    %53 = vector.shape_cast %52 : vector<2x1x128xf32> to vector<2x128xf32>
    %cst_17 = arith.constant dense<0.000000e+00> : vector<2x128xf32>
    %54 = tpu.matmul %51, %7, %cst_17 {dimension_numbers = #tpu.dot_dimension_numbers<[1], [0], [0], [1], [0, 0, 1, 1], [], []>} : vector<2x32xf32>, vector<32x128xf32>, vector<2x128xf32> -> vector<2x128xf32>
    %55 = arith.addf %53, %54 : vector<2x128xf32>
    %cst_18 = arith.constant 0.000000e+00 : f32
    %56 = vector.broadcast %cst_18 : f32 to vector<2x128xf32>
    %57 = arith.subf %56, %55 : vector<2x128xf32>
    %58 = math.exp %57 : vector<2x128xf32>
    %cst_19 = arith.constant 1.000000e+00 : f32
    %59 = vector.broadcast %cst_19 : f32 to vector<2x128xf32>
    %60 = arith.addf %59, %58 : vector<2x128xf32>
    %cst_20 = arith.constant 1.000000e+00 : f32
    %61 = vector.broadcast %cst_20 : f32 to vector<2x128xf32>
    %62 = arith.divf %61, %60 : vector<2x128xf32>
    %63 = vector.extract_strided_slice %62 {offsets = [0, 0], sizes = [2, 32], strides = [1, 1]} : vector<2x128xf32> to vector<2x32xf32>
    %64 = vector.extract_strided_slice %62 {offsets = [0, 32], sizes = [2, 32], strides = [1, 1]} : vector<2x128xf32> to vector<2x32xf32>
    %65 = vector.extract_strided_slice %62 {offsets = [0, 64], sizes = [2, 32], strides = [1, 1]} : vector<2x128xf32> to vector<2x32xf32>
    %66 = vector.extract_strided_slice %55 {offsets = [0, 96], sizes = [2, 32], strides = [1, 1]} : vector<2x128xf32> to vector<2x32xf32>
    %67 = math.tanh %66 : vector<2x32xf32>
    %68 = arith.mulf %64, %49 : vector<2x32xf32>
    %69 = arith.mulf %63, %67 : vector<2x32xf32>
    %70 = arith.addf %68, %69 : vector<2x32xf32>
    %71 = math.tanh %70 : vector<2x32xf32>
    %72 = arith.mulf %65, %71 : vector<2x32xf32>
    %73 = vector.extract_strided_slice %6 {offsets = [0, 3, 0], sizes = [2, 1, 128], strides = [1, 1, 1]} : vector<2x16x128xf32> to vector<2x1x128xf32>
    %74 = vector.shape_cast %73 : vector<2x1x128xf32> to vector<2x128xf32>
    %cst_21 = arith.constant dense<0.000000e+00> : vector<2x128xf32>
    %75 = tpu.matmul %72, %7, %cst_21 {dimension_numbers = #tpu.dot_dimension_numbers<[1], [0], [0], [1], [0, 0, 1, 1], [], []>} : vector<2x32xf32>, vector<32x128xf32>, vector<2x128xf32> -> vector<2x128xf32>
    %76 = arith.addf %74, %75 : vector<2x128xf32>
    %cst_22 = arith.constant 0.000000e+00 : f32
    %77 = vector.broadcast %cst_22 : f32 to vector<2x128xf32>
    %78 = arith.subf %77, %76 : vector<2x128xf32>
    %79 = math.exp %78 : vector<2x128xf32>
    %cst_23 = arith.constant 1.000000e+00 : f32
    %80 = vector.broadcast %cst_23 : f32 to vector<2x128xf32>
    %81 = arith.addf %80, %79 : vector<2x128xf32>
    %cst_24 = arith.constant 1.000000e+00 : f32
    %82 = vector.broadcast %cst_24 : f32 to vector<2x128xf32>
    %83 = arith.divf %82, %81 : vector<2x128xf32>
    %84 = vector.extract_strided_slice %83 {offsets = [0, 0], sizes = [2, 32], strides = [1, 1]} : vector<2x128xf32> to vector<2x32xf32>
    %85 = vector.extract_strided_slice %83 {offsets = [0, 32], sizes = [2, 32], strides = [1, 1]} : vector<2x128xf32> to vector<2x32xf32>
    %86 = vector.extract_strided_slice %83 {offsets = [0, 64], sizes = [2, 32], strides = [1, 1]} : vector<2x128xf32> to vector<2x32xf32>
    %87 = vector.extract_strided_slice %76 {offsets = [0, 96], sizes = [2, 32], strides = [1, 1]} : vector<2x128xf32> to vector<2x32xf32>
    %88 = math.tanh %87 : vector<2x32xf32>
    %89 = arith.mulf %85, %70 : vector<2x32xf32>
    %90 = arith.mulf %84, %88 : vector<2x32xf32>
    %91 = arith.addf %89, %90 : vector<2x32xf32>
    %92 = math.tanh %91 : vector<2x32xf32>
    %93 = arith.mulf %86, %92 : vector<2x32xf32>
    %94 = vector.extract_strided_slice %6 {offsets = [0, 4, 0], sizes = [2, 1, 128], strides = [1, 1, 1]} : vector<2x16x128xf32> to vector<2x1x128xf32>
    %95 = vector.shape_cast %94 : vector<2x1x128xf32> to vector<2x128xf32>
    %cst_25 = arith.constant dense<0.000000e+00> : vector<2x128xf32>
    %96 = tpu.matmul %93, %7, %cst_25 {dimension_numbers = #tpu.dot_dimension_numbers<[1], [0], [0], [1], [0, 0, 1, 1], [], []>} : vector<2x32xf32>, vector<32x128xf32>, vector<2x128xf32> -> vector<2x128xf32>
    %97 = arith.addf %95, %96 : vector<2x128xf32>
    %cst_26 = arith.constant 0.000000e+00 : f32
    %98 = vector.broadcast %cst_26 : f32 to vector<2x128xf32>
    %99 = arith.subf %98, %97 : vector<2x128xf32>
    %100 = math.exp %99 : vector<2x128xf32>
    %cst_27 = arith.constant 1.000000e+00 : f32
    %101 = vector.broadcast %cst_27 : f32 to vector<2x128xf32>
    %102 = arith.addf %101, %100 : vector<2x128xf32>
    %cst_28 = arith.constant 1.000000e+00 : f32
    %103 = vector.broadcast %cst_28 : f32 to vector<2x128xf32>
    %104 = arith.divf %103, %102 : vector<2x128xf32>
    %105 = vector.extract_strided_slice %104 {offsets = [0, 0], sizes = [2, 32], strides = [1, 1]} : vector<2x128xf32> to vector<2x32xf32>
    %106 = vector.extract_strided_slice %104 {offsets = [0, 32], sizes = [2, 32], strides = [1, 1]} : vector<2x128xf32> to vector<2x32xf32>
    %107 = vector.extract_strided_slice %104 {offsets = [0, 64], sizes = [2, 32], strides = [1, 1]} : vector<2x128xf32> to vector<2x32xf32>
    %108 = vector.extract_strided_slice %97 {offsets = [0, 96], sizes = [2, 32], strides = [1, 1]} : vector<2x128xf32> to vector<2x32xf32>
    %109 = math.tanh %108 : vector<2x32xf32>
    %110 = arith.mulf %106, %91 : vector<2x32xf32>
    %111 = arith.mulf %105, %109 : vector<2x32xf32>
    %112 = arith.addf %110, %111 : vector<2x32xf32>
    %113 = math.tanh %112 : vector<2x32xf32>
    %114 = arith.mulf %107, %113 : vector<2x32xf32>
    %115 = vector.extract_strided_slice %6 {offsets = [0, 5, 0], sizes = [2, 1, 128], strides = [1, 1, 1]} : vector<2x16x128xf32> to vector<2x1x128xf32>
    %116 = vector.shape_cast %115 : vector<2x1x128xf32> to vector<2x128xf32>
    %cst_29 = arith.constant dense<0.000000e+00> : vector<2x128xf32>
    %117 = tpu.matmul %114, %7, %cst_29 {dimension_numbers = #tpu.dot_dimension_numbers<[1], [0], [0], [1], [0, 0, 1, 1], [], []>} : vector<2x32xf32>, vector<32x128xf32>, vector<2x128xf32> -> vector<2x128xf32>
    %118 = arith.addf %116, %117 : vector<2x128xf32>
    %cst_30 = arith.constant 0.000000e+00 : f32
    %119 = vector.broadcast %cst_30 : f32 to vector<2x128xf32>
    %120 = arith.subf %119, %118 : vector<2x128xf32>
    %121 = math.exp %120 : vector<2x128xf32>
    %cst_31 = arith.constant 1.000000e+00 : f32
    %122 = vector.broadcast %cst_31 : f32 to vector<2x128xf32>
    %123 = arith.addf %122, %121 : vector<2x128xf32>
    %cst_32 = arith.constant 1.000000e+00 : f32
    %124 = vector.broadcast %cst_32 : f32 to vector<2x128xf32>
    %125 = arith.divf %124, %123 : vector<2x128xf32>
    %126 = vector.extract_strided_slice %125 {offsets = [0, 0], sizes = [2, 32], strides = [1, 1]} : vector<2x128xf32> to vector<2x32xf32>
    %127 = vector.extract_strided_slice %125 {offsets = [0, 32], sizes = [2, 32], strides = [1, 1]} : vector<2x128xf32> to vector<2x32xf32>
    %128 = vector.extract_strided_slice %125 {offsets = [0, 64], sizes = [2, 32], strides = [1, 1]} : vector<2x128xf32> to vector<2x32xf32>
    %129 = vector.extract_strided_slice %118 {offsets = [0, 96], sizes = [2, 32], strides = [1, 1]} : vector<2x128xf32> to vector<2x32xf32>
    %130 = math.tanh %129 : vector<2x32xf32>
    %131 = arith.mulf %127, %112 : vector<2x32xf32>
    %132 = arith.mulf %126, %130 : vector<2x32xf32>
    %133 = arith.addf %131, %132 : vector<2x32xf32>
    %134 = math.tanh %133 : vector<2x32xf32>
    %135 = arith.mulf %128, %134 : vector<2x32xf32>
    %136 = vector.extract_strided_slice %6 {offsets = [0, 6, 0], sizes = [2, 1, 128], strides = [1, 1, 1]} : vector<2x16x128xf32> to vector<2x1x128xf32>
    %137 = vector.shape_cast %136 : vector<2x1x128xf32> to vector<2x128xf32>
    %cst_33 = arith.constant dense<0.000000e+00> : vector<2x128xf32>
    %138 = tpu.matmul %135, %7, %cst_33 {dimension_numbers = #tpu.dot_dimension_numbers<[1], [0], [0], [1], [0, 0, 1, 1], [], []>} : vector<2x32xf32>, vector<32x128xf32>, vector<2x128xf32> -> vector<2x128xf32>
    %139 = arith.addf %137, %138 : vector<2x128xf32>
    %cst_34 = arith.constant 0.000000e+00 : f32
    %140 = vector.broadcast %cst_34 : f32 to vector<2x128xf32>
    %141 = arith.subf %140, %139 : vector<2x128xf32>
    %142 = math.exp %141 : vector<2x128xf32>
    %cst_35 = arith.constant 1.000000e+00 : f32
    %143 = vector.broadcast %cst_35 : f32 to vector<2x128xf32>
    %144 = arith.addf %143, %142 : vector<2x128xf32>
    %cst_36 = arith.constant 1.000000e+00 : f32
    %145 = vector.broadcast %cst_36 : f32 to vector<2x128xf32>
    %146 = arith.divf %145, %144 : vector<2x128xf32>
    %147 = vector.extract_strided_slice %146 {offsets = [0, 0], sizes = [2, 32], strides = [1, 1]} : vector<2x128xf32> to vector<2x32xf32>
    %148 = vector.extract_strided_slice %146 {offsets = [0, 32], sizes = [2, 32], strides = [1, 1]} : vector<2x128xf32> to vector<2x32xf32>
    %149 = vector.extract_strided_slice %146 {offsets = [0, 64], sizes = [2, 32], strides = [1, 1]} : vector<2x128xf32> to vector<2x32xf32>
    %150 = vector.extract_strided_slice %139 {offsets = [0, 96], sizes = [2, 32], strides = [1, 1]} : vector<2x128xf32> to vector<2x32xf32>
    %151 = math.tanh %150 : vector<2x32xf32>
    %152 = arith.mulf %148, %133 : vector<2x32xf32>
    %153 = arith.mulf %147, %151 : vector<2x32xf32>
    %154 = arith.addf %152, %153 : vector<2x32xf32>
    %155 = math.tanh %154 : vector<2x32xf32>
    %156 = arith.mulf %149, %155 : vector<2x32xf32>
    %157 = vector.extract_strided_slice %6 {offsets = [0, 7, 0], sizes = [2, 1, 128], strides = [1, 1, 1]} : vector<2x16x128xf32> to vector<2x1x128xf32>
    %158 = vector.shape_cast %157 : vector<2x1x128xf32> to vector<2x128xf32>
    %cst_37 = arith.constant dense<0.000000e+00> : vector<2x128xf32>
    %159 = tpu.matmul %156, %7, %cst_37 {dimension_numbers = #tpu.dot_dimension_numbers<[1], [0], [0], [1], [0, 0, 1, 1], [], []>} : vector<2x32xf32>, vector<32x128xf32>, vector<2x128xf32> -> vector<2x128xf32>
    %160 = arith.addf %158, %159 : vector<2x128xf32>
    %cst_38 = arith.constant 0.000000e+00 : f32
    %161 = vector.broadcast %cst_38 : f32 to vector<2x128xf32>
    %162 = arith.subf %161, %160 : vector<2x128xf32>
    %163 = math.exp %162 : vector<2x128xf32>
    %cst_39 = arith.constant 1.000000e+00 : f32
    %164 = vector.broadcast %cst_39 : f32 to vector<2x128xf32>
    %165 = arith.addf %164, %163 : vector<2x128xf32>
    %cst_40 = arith.constant 1.000000e+00 : f32
    %166 = vector.broadcast %cst_40 : f32 to vector<2x128xf32>
    %167 = arith.divf %166, %165 : vector<2x128xf32>
    %168 = vector.extract_strided_slice %167 {offsets = [0, 0], sizes = [2, 32], strides = [1, 1]} : vector<2x128xf32> to vector<2x32xf32>
    %169 = vector.extract_strided_slice %167 {offsets = [0, 32], sizes = [2, 32], strides = [1, 1]} : vector<2x128xf32> to vector<2x32xf32>
    %170 = vector.extract_strided_slice %167 {offsets = [0, 64], sizes = [2, 32], strides = [1, 1]} : vector<2x128xf32> to vector<2x32xf32>
    %171 = vector.extract_strided_slice %160 {offsets = [0, 96], sizes = [2, 32], strides = [1, 1]} : vector<2x128xf32> to vector<2x32xf32>
    %172 = math.tanh %171 : vector<2x32xf32>
    %173 = arith.mulf %169, %154 : vector<2x32xf32>
    %174 = arith.mulf %168, %172 : vector<2x32xf32>
    %175 = arith.addf %173, %174 : vector<2x32xf32>
    %176 = math.tanh %175 : vector<2x32xf32>
    %177 = arith.mulf %170, %176 : vector<2x32xf32>
    %178 = vector.extract_strided_slice %6 {offsets = [0, 8, 0], sizes = [2, 1, 128], strides = [1, 1, 1]} : vector<2x16x128xf32> to vector<2x1x128xf32>
    %179 = vector.shape_cast %178 : vector<2x1x128xf32> to vector<2x128xf32>
    %cst_41 = arith.constant dense<0.000000e+00> : vector<2x128xf32>
    %180 = tpu.matmul %177, %7, %cst_41 {dimension_numbers = #tpu.dot_dimension_numbers<[1], [0], [0], [1], [0, 0, 1, 1], [], []>} : vector<2x32xf32>, vector<32x128xf32>, vector<2x128xf32> -> vector<2x128xf32>
    %181 = arith.addf %179, %180 : vector<2x128xf32>
    %cst_42 = arith.constant 0.000000e+00 : f32
    %182 = vector.broadcast %cst_42 : f32 to vector<2x128xf32>
    %183 = arith.subf %182, %181 : vector<2x128xf32>
    %184 = math.exp %183 : vector<2x128xf32>
    %cst_43 = arith.constant 1.000000e+00 : f32
    %185 = vector.broadcast %cst_43 : f32 to vector<2x128xf32>
    %186 = arith.addf %185, %184 : vector<2x128xf32>
    %cst_44 = arith.constant 1.000000e+00 : f32
    %187 = vector.broadcast %cst_44 : f32 to vector<2x128xf32>
    %188 = arith.divf %187, %186 : vector<2x128xf32>
    %189 = vector.extract_strided_slice %188 {offsets = [0, 0], sizes = [2, 32], strides = [1, 1]} : vector<2x128xf32> to vector<2x32xf32>
    %190 = vector.extract_strided_slice %188 {offsets = [0, 32], sizes = [2, 32], strides = [1, 1]} : vector<2x128xf32> to vector<2x32xf32>
    %191 = vector.extract_strided_slice %188 {offsets = [0, 64], sizes = [2, 32], strides = [1, 1]} : vector<2x128xf32> to vector<2x32xf32>
    %192 = vector.extract_strided_slice %181 {offsets = [0, 96], sizes = [2, 32], strides = [1, 1]} : vector<2x128xf32> to vector<2x32xf32>
    %193 = math.tanh %192 : vector<2x32xf32>
    %194 = arith.mulf %190, %175 : vector<2x32xf32>
    %195 = arith.mulf %189, %193 : vector<2x32xf32>
    %196 = arith.addf %194, %195 : vector<2x32xf32>
    %197 = math.tanh %196 : vector<2x32xf32>
    %198 = arith.mulf %191, %197 : vector<2x32xf32>
    %199 = vector.extract_strided_slice %6 {offsets = [0, 9, 0], sizes = [2, 1, 128], strides = [1, 1, 1]} : vector<2x16x128xf32> to vector<2x1x128xf32>
    %200 = vector.shape_cast %199 : vector<2x1x128xf32> to vector<2x128xf32>
    %cst_45 = arith.constant dense<0.000000e+00> : vector<2x128xf32>
    %201 = tpu.matmul %198, %7, %cst_45 {dimension_numbers = #tpu.dot_dimension_numbers<[1], [0], [0], [1], [0, 0, 1, 1], [], []>} : vector<2x32xf32>, vector<32x128xf32>, vector<2x128xf32> -> vector<2x128xf32>
    %202 = arith.addf %200, %201 : vector<2x128xf32>
    %cst_46 = arith.constant 0.000000e+00 : f32
    %203 = vector.broadcast %cst_46 : f32 to vector<2x128xf32>
    %204 = arith.subf %203, %202 : vector<2x128xf32>
    %205 = math.exp %204 : vector<2x128xf32>
    %cst_47 = arith.constant 1.000000e+00 : f32
    %206 = vector.broadcast %cst_47 : f32 to vector<2x128xf32>
    %207 = arith.addf %206, %205 : vector<2x128xf32>
    %cst_48 = arith.constant 1.000000e+00 : f32
    %208 = vector.broadcast %cst_48 : f32 to vector<2x128xf32>
    %209 = arith.divf %208, %207 : vector<2x128xf32>
    %210 = vector.extract_strided_slice %209 {offsets = [0, 0], sizes = [2, 32], strides = [1, 1]} : vector<2x128xf32> to vector<2x32xf32>
    %211 = vector.extract_strided_slice %209 {offsets = [0, 32], sizes = [2, 32], strides = [1, 1]} : vector<2x128xf32> to vector<2x32xf32>
    %212 = vector.extract_strided_slice %209 {offsets = [0, 64], sizes = [2, 32], strides = [1, 1]} : vector<2x128xf32> to vector<2x32xf32>
    %213 = vector.extract_strided_slice %202 {offsets = [0, 96], sizes = [2, 32], strides = [1, 1]} : vector<2x128xf32> to vector<2x32xf32>
    %214 = math.tanh %213 : vector<2x32xf32>
    %215 = arith.mulf %211, %196 : vector<2x32xf32>
    %216 = arith.mulf %210, %214 : vector<2x32xf32>
    %217 = arith.addf %215, %216 : vector<2x32xf32>
    %218 = math.tanh %217 : vector<2x32xf32>
    %219 = arith.mulf %212, %218 : vector<2x32xf32>
    %220 = vector.extract_strided_slice %6 {offsets = [0, 10, 0], sizes = [2, 1, 128], strides = [1, 1, 1]} : vector<2x16x128xf32> to vector<2x1x128xf32>
    %221 = vector.shape_cast %220 : vector<2x1x128xf32> to vector<2x128xf32>
    %cst_49 = arith.constant dense<0.000000e+00> : vector<2x128xf32>
    %222 = tpu.matmul %219, %7, %cst_49 {dimension_numbers = #tpu.dot_dimension_numbers<[1], [0], [0], [1], [0, 0, 1, 1], [], []>} : vector<2x32xf32>, vector<32x128xf32>, vector<2x128xf32> -> vector<2x128xf32>
    %223 = arith.addf %221, %222 : vector<2x128xf32>
    %cst_50 = arith.constant 0.000000e+00 : f32
    %224 = vector.broadcast %cst_50 : f32 to vector<2x128xf32>
    %225 = arith.subf %224, %223 : vector<2x128xf32>
    %226 = math.exp %225 : vector<2x128xf32>
    %cst_51 = arith.constant 1.000000e+00 : f32
    %227 = vector.broadcast %cst_51 : f32 to vector<2x128xf32>
    %228 = arith.addf %227, %226 : vector<2x128xf32>
    %cst_52 = arith.constant 1.000000e+00 : f32
    %229 = vector.broadcast %cst_52 : f32 to vector<2x128xf32>
    %230 = arith.divf %229, %228 : vector<2x128xf32>
    %231 = vector.extract_strided_slice %230 {offsets = [0, 0], sizes = [2, 32], strides = [1, 1]} : vector<2x128xf32> to vector<2x32xf32>
    %232 = vector.extract_strided_slice %230 {offsets = [0, 32], sizes = [2, 32], strides = [1, 1]} : vector<2x128xf32> to vector<2x32xf32>
    %233 = vector.extract_strided_slice %230 {offsets = [0, 64], sizes = [2, 32], strides = [1, 1]} : vector<2x128xf32> to vector<2x32xf32>
    %234 = vector.extract_strided_slice %223 {offsets = [0, 96], sizes = [2, 32], strides = [1, 1]} : vector<2x128xf32> to vector<2x32xf32>
    %235 = math.tanh %234 : vector<2x32xf32>
    %236 = arith.mulf %232, %217 : vector<2x32xf32>
    %237 = arith.mulf %231, %235 : vector<2x32xf32>
    %238 = arith.addf %236, %237 : vector<2x32xf32>
    %239 = math.tanh %238 : vector<2x32xf32>
    %240 = arith.mulf %233, %239 : vector<2x32xf32>
    %241 = vector.extract_strided_slice %6 {offsets = [0, 11, 0], sizes = [2, 1, 128], strides = [1, 1, 1]} : vector<2x16x128xf32> to vector<2x1x128xf32>
    %242 = vector.shape_cast %241 : vector<2x1x128xf32> to vector<2x128xf32>
    %cst_53 = arith.constant dense<0.000000e+00> : vector<2x128xf32>
    %243 = tpu.matmul %240, %7, %cst_53 {dimension_numbers = #tpu.dot_dimension_numbers<[1], [0], [0], [1], [0, 0, 1, 1], [], []>} : vector<2x32xf32>, vector<32x128xf32>, vector<2x128xf32> -> vector<2x128xf32>
    %244 = arith.addf %242, %243 : vector<2x128xf32>
    %cst_54 = arith.constant 0.000000e+00 : f32
    %245 = vector.broadcast %cst_54 : f32 to vector<2x128xf32>
    %246 = arith.subf %245, %244 : vector<2x128xf32>
    %247 = math.exp %246 : vector<2x128xf32>
    %cst_55 = arith.constant 1.000000e+00 : f32
    %248 = vector.broadcast %cst_55 : f32 to vector<2x128xf32>
    %249 = arith.addf %248, %247 : vector<2x128xf32>
    %cst_56 = arith.constant 1.000000e+00 : f32
    %250 = vector.broadcast %cst_56 : f32 to vector<2x128xf32>
    %251 = arith.divf %250, %249 : vector<2x128xf32>
    %252 = vector.extract_strided_slice %251 {offsets = [0, 0], sizes = [2, 32], strides = [1, 1]} : vector<2x128xf32> to vector<2x32xf32>
    %253 = vector.extract_strided_slice %251 {offsets = [0, 32], sizes = [2, 32], strides = [1, 1]} : vector<2x128xf32> to vector<2x32xf32>
    %254 = vector.extract_strided_slice %251 {offsets = [0, 64], sizes = [2, 32], strides = [1, 1]} : vector<2x128xf32> to vector<2x32xf32>
    %255 = vector.extract_strided_slice %244 {offsets = [0, 96], sizes = [2, 32], strides = [1, 1]} : vector<2x128xf32> to vector<2x32xf32>
    %256 = math.tanh %255 : vector<2x32xf32>
    %257 = arith.mulf %253, %238 : vector<2x32xf32>
    %258 = arith.mulf %252, %256 : vector<2x32xf32>
    %259 = arith.addf %257, %258 : vector<2x32xf32>
    %260 = math.tanh %259 : vector<2x32xf32>
    %261 = arith.mulf %254, %260 : vector<2x32xf32>
    %262 = vector.extract_strided_slice %6 {offsets = [0, 12, 0], sizes = [2, 1, 128], strides = [1, 1, 1]} : vector<2x16x128xf32> to vector<2x1x128xf32>
    %263 = vector.shape_cast %262 : vector<2x1x128xf32> to vector<2x128xf32>
    %cst_57 = arith.constant dense<0.000000e+00> : vector<2x128xf32>
    %264 = tpu.matmul %261, %7, %cst_57 {dimension_numbers = #tpu.dot_dimension_numbers<[1], [0], [0], [1], [0, 0, 1, 1], [], []>} : vector<2x32xf32>, vector<32x128xf32>, vector<2x128xf32> -> vector<2x128xf32>
    %265 = arith.addf %263, %264 : vector<2x128xf32>
    %cst_58 = arith.constant 0.000000e+00 : f32
    %266 = vector.broadcast %cst_58 : f32 to vector<2x128xf32>
    %267 = arith.subf %266, %265 : vector<2x128xf32>
    %268 = math.exp %267 : vector<2x128xf32>
    %cst_59 = arith.constant 1.000000e+00 : f32
    %269 = vector.broadcast %cst_59 : f32 to vector<2x128xf32>
    %270 = arith.addf %269, %268 : vector<2x128xf32>
    %cst_60 = arith.constant 1.000000e+00 : f32
    %271 = vector.broadcast %cst_60 : f32 to vector<2x128xf32>
    %272 = arith.divf %271, %270 : vector<2x128xf32>
    %273 = vector.extract_strided_slice %272 {offsets = [0, 0], sizes = [2, 32], strides = [1, 1]} : vector<2x128xf32> to vector<2x32xf32>
    %274 = vector.extract_strided_slice %272 {offsets = [0, 32], sizes = [2, 32], strides = [1, 1]} : vector<2x128xf32> to vector<2x32xf32>
    %275 = vector.extract_strided_slice %272 {offsets = [0, 64], sizes = [2, 32], strides = [1, 1]} : vector<2x128xf32> to vector<2x32xf32>
    %276 = vector.extract_strided_slice %265 {offsets = [0, 96], sizes = [2, 32], strides = [1, 1]} : vector<2x128xf32> to vector<2x32xf32>
    %277 = math.tanh %276 : vector<2x32xf32>
    %278 = arith.mulf %274, %259 : vector<2x32xf32>
    %279 = arith.mulf %273, %277 : vector<2x32xf32>
    %280 = arith.addf %278, %279 : vector<2x32xf32>
    %281 = math.tanh %280 : vector<2x32xf32>
    %282 = arith.mulf %275, %281 : vector<2x32xf32>
    %283 = vector.extract_strided_slice %6 {offsets = [0, 13, 0], sizes = [2, 1, 128], strides = [1, 1, 1]} : vector<2x16x128xf32> to vector<2x1x128xf32>
    %284 = vector.shape_cast %283 : vector<2x1x128xf32> to vector<2x128xf32>
    %cst_61 = arith.constant dense<0.000000e+00> : vector<2x128xf32>
    %285 = tpu.matmul %282, %7, %cst_61 {dimension_numbers = #tpu.dot_dimension_numbers<[1], [0], [0], [1], [0, 0, 1, 1], [], []>} : vector<2x32xf32>, vector<32x128xf32>, vector<2x128xf32> -> vector<2x128xf32>
    %286 = arith.addf %284, %285 : vector<2x128xf32>
    %cst_62 = arith.constant 0.000000e+00 : f32
    %287 = vector.broadcast %cst_62 : f32 to vector<2x128xf32>
    %288 = arith.subf %287, %286 : vector<2x128xf32>
    %289 = math.exp %288 : vector<2x128xf32>
    %cst_63 = arith.constant 1.000000e+00 : f32
    %290 = vector.broadcast %cst_63 : f32 to vector<2x128xf32>
    %291 = arith.addf %290, %289 : vector<2x128xf32>
    %cst_64 = arith.constant 1.000000e+00 : f32
    %292 = vector.broadcast %cst_64 : f32 to vector<2x128xf32>
    %293 = arith.divf %292, %291 : vector<2x128xf32>
    %294 = vector.extract_strided_slice %293 {offsets = [0, 0], sizes = [2, 32], strides = [1, 1]} : vector<2x128xf32> to vector<2x32xf32>
    %295 = vector.extract_strided_slice %293 {offsets = [0, 32], sizes = [2, 32], strides = [1, 1]} : vector<2x128xf32> to vector<2x32xf32>
    %296 = vector.extract_strided_slice %293 {offsets = [0, 64], sizes = [2, 32], strides = [1, 1]} : vector<2x128xf32> to vector<2x32xf32>
    %297 = vector.extract_strided_slice %286 {offsets = [0, 96], sizes = [2, 32], strides = [1, 1]} : vector<2x128xf32> to vector<2x32xf32>
    %298 = math.tanh %297 : vector<2x32xf32>
    %299 = arith.mulf %295, %280 : vector<2x32xf32>
    %300 = arith.mulf %294, %298 : vector<2x32xf32>
    %301 = arith.addf %299, %300 : vector<2x32xf32>
    %302 = math.tanh %301 : vector<2x32xf32>
    %303 = arith.mulf %296, %302 : vector<2x32xf32>
    %304 = vector.extract_strided_slice %6 {offsets = [0, 14, 0], sizes = [2, 1, 128], strides = [1, 1, 1]} : vector<2x16x128xf32> to vector<2x1x128xf32>
    %305 = vector.shape_cast %304 : vector<2x1x128xf32> to vector<2x128xf32>
    %cst_65 = arith.constant dense<0.000000e+00> : vector<2x128xf32>
    %306 = tpu.matmul %303, %7, %cst_65 {dimension_numbers = #tpu.dot_dimension_numbers<[1], [0], [0], [1], [0, 0, 1, 1], [], []>} : vector<2x32xf32>, vector<32x128xf32>, vector<2x128xf32> -> vector<2x128xf32>
    %307 = arith.addf %305, %306 : vector<2x128xf32>
    %cst_66 = arith.constant 0.000000e+00 : f32
    %308 = vector.broadcast %cst_66 : f32 to vector<2x128xf32>
    %309 = arith.subf %308, %307 : vector<2x128xf32>
    %310 = math.exp %309 : vector<2x128xf32>
    %cst_67 = arith.constant 1.000000e+00 : f32
    %311 = vector.broadcast %cst_67 : f32 to vector<2x128xf32>
    %312 = arith.addf %311, %310 : vector<2x128xf32>
    %cst_68 = arith.constant 1.000000e+00 : f32
    %313 = vector.broadcast %cst_68 : f32 to vector<2x128xf32>
    %314 = arith.divf %313, %312 : vector<2x128xf32>
    %315 = vector.extract_strided_slice %314 {offsets = [0, 0], sizes = [2, 32], strides = [1, 1]} : vector<2x128xf32> to vector<2x32xf32>
    %316 = vector.extract_strided_slice %314 {offsets = [0, 32], sizes = [2, 32], strides = [1, 1]} : vector<2x128xf32> to vector<2x32xf32>
    %317 = vector.extract_strided_slice %314 {offsets = [0, 64], sizes = [2, 32], strides = [1, 1]} : vector<2x128xf32> to vector<2x32xf32>
    %318 = vector.extract_strided_slice %307 {offsets = [0, 96], sizes = [2, 32], strides = [1, 1]} : vector<2x128xf32> to vector<2x32xf32>
    %319 = math.tanh %318 : vector<2x32xf32>
    %320 = arith.mulf %316, %301 : vector<2x32xf32>
    %321 = arith.mulf %315, %319 : vector<2x32xf32>
    %322 = arith.addf %320, %321 : vector<2x32xf32>
    %323 = math.tanh %322 : vector<2x32xf32>
    %324 = arith.mulf %317, %323 : vector<2x32xf32>
    %325 = vector.extract_strided_slice %6 {offsets = [0, 15, 0], sizes = [2, 1, 128], strides = [1, 1, 1]} : vector<2x16x128xf32> to vector<2x1x128xf32>
    %326 = vector.shape_cast %325 : vector<2x1x128xf32> to vector<2x128xf32>
    %cst_69 = arith.constant dense<0.000000e+00> : vector<2x128xf32>
    %327 = tpu.matmul %324, %7, %cst_69 {dimension_numbers = #tpu.dot_dimension_numbers<[1], [0], [0], [1], [0, 0, 1, 1], [], []>} : vector<2x32xf32>, vector<32x128xf32>, vector<2x128xf32> -> vector<2x128xf32>
    %328 = arith.addf %326, %327 : vector<2x128xf32>
    %cst_70 = arith.constant 0.000000e+00 : f32
    %329 = vector.broadcast %cst_70 : f32 to vector<2x128xf32>
    %330 = arith.subf %329, %328 : vector<2x128xf32>
    %331 = math.exp %330 : vector<2x128xf32>
    %cst_71 = arith.constant 1.000000e+00 : f32
    %332 = vector.broadcast %cst_71 : f32 to vector<2x128xf32>
    %333 = arith.addf %332, %331 : vector<2x128xf32>
    %cst_72 = arith.constant 1.000000e+00 : f32
    %334 = vector.broadcast %cst_72 : f32 to vector<2x128xf32>
    %335 = arith.divf %334, %333 : vector<2x128xf32>
    %336 = vector.extract_strided_slice %335 {offsets = [0, 0], sizes = [2, 32], strides = [1, 1]} : vector<2x128xf32> to vector<2x32xf32>
    %337 = vector.extract_strided_slice %335 {offsets = [0, 32], sizes = [2, 32], strides = [1, 1]} : vector<2x128xf32> to vector<2x32xf32>
    %338 = vector.extract_strided_slice %335 {offsets = [0, 64], sizes = [2, 32], strides = [1, 1]} : vector<2x128xf32> to vector<2x32xf32>
    %339 = vector.extract_strided_slice %328 {offsets = [0, 96], sizes = [2, 32], strides = [1, 1]} : vector<2x128xf32> to vector<2x32xf32>
    %340 = math.tanh %339 : vector<2x32xf32>
    %341 = arith.mulf %337, %322 : vector<2x32xf32>
    %342 = arith.mulf %336, %340 : vector<2x32xf32>
    %343 = arith.addf %341, %342 : vector<2x32xf32>
    %344 = math.tanh %343 : vector<2x32xf32>
    %345 = arith.mulf %338, %344 : vector<2x32xf32>
    %c0_73 = arith.constant 0 : index
    %c0_74 = arith.constant 0 : index
    %346 = vector.load %arg4[%c0_73, %c0_74] : memref<2x32xf32, #tpu.memory_space<vmem>>, vector<2x32xf32>
    tpu.vector_store %arg4[%c0_73, %c0_74], %345 {strides = array<i32>} : memref<2x32xf32, #tpu.memory_space<vmem>>, vector<2x32xf32>,
    return
  }
}

</mosaic_0001>

<bundles_post_ra>
// kernel: tpu_custom_call.1
= control target key start
LH: loop header
LB: loop body
LE: loop exit
PB: predicated region body
PF: predicated region fallthrough
CT: control target
= control target key end

     0   :  { %vm30_vm0 = vcmask 64512   ;;  %v3052_v3 = vmov 0.0|0.0   ;;  %vm3053_vm1 = vmmov 0   ;;  %v3054_v10 = vmov 0.0   ;;  %s3413_s0 = inlined_call_operand.vmem [shape: f32[32,8], index: 0, kind: input, shape index: {}]   ;;  %s3414_s1 = inlined_call_operand.vmem [shape: f32[8,128], index: 1, kind: input, shape index: {}]   ;;  %s3415_s2 = inlined_call_operand.vmem [shape: f32[1,128], index: 2, kind: input, shape index: {}]   ;;  %s3416_s3 = inlined_call_operand.vmem [shape: f32[32,128], index: 3, kind: input, shape index: {}]   ;;  %s3417_s4 = inlined_call_operand.hbm [shape: f32[2,32], index: 4, kind: output, shape index: {}]  }
   0x1   :  { %v22_v0 = vld [vmem:[%s3414_s1] sm:$0xff]  ;;  %2670 = vmatprep.subr.bf16.mxu1 %v3052_v3  ;;  %v129_v4 = vld [vmem:[%s3416_s3 + $0x8] sm:$0xff]  ;;  %v20_v6 = vld [vmem:[%s3413_s0 + $0x10] sm:$0xff]  ;;  %2502 = vmatprep.mubr.msk.f32.mxu1 %vm3053_vm1, %v3054_v10 }
   0x2   :  { %v18_v1 = vld [vmem:[%s3413_s0] sm:$0xff]  ;;  %2486 = vmatprep.subr.mxu0 %v22_v0  ;;  %v19_v5 = vld [vmem:[%s3413_s0 + $0x8] sm:$0xff]  ;;  %v130_v8 = vld [vmem:[%s3416_s3 + $0x10] sm:$0xff] }
   0x3   :  { %v128_v2 = vld [vmem:[%s3416_s3] sm:$0xff]  ;;  %2487 = vmatpush3.msra.mxu0 %v22_v0  ;;  %2488 = vmatprep.mubr.msk.f32.mxu0 %vm30_vm0, %v18_v1  ;;  %v131_v9 = vld [vmem:[%s3416_s3 + $0x18] sm:$0xff] }
   0x4   :  { %v3103_v7 = vpack.c.bf16 %v129_v4, %v128_v2  ;;  %2489 = vmatmul.mubr.msk.f32.vlgmr.msra.gmra.mrb[0].mxu0 %vm30_vm0, %v19_v5 }
   0x5   :  { %9 = vsyncpa [#allocation3], 0  ;;  %2491 = vmatprep.mubr.msk.f32.mxu0 %vm30_vm0, %v20_v6  ;;  %v3116_v11 = vpack.c.bf16 %v131_v9, %v130_v8  ;;  %v21_v12 = vld [vmem:[%s3413_s0 + $0x18] sm:$0xff]  ;;  %2676 = vmatprep.subr.bf16.mxu0 %v3052_v3  ;;  %v2381_v13 = vld [vmem:[%s3415_s2] ss:$0 sm:$0xff]  ;;  %s3055_s2 = smov 32  }
   0x6   :  { %2672 = vmatpush3.bf16.msra.mxu1 %v3103_v7  ;;  %2678 = vmatpush3.bf16.msra.mxu0 %v3103_v7  ;;  %vm263_vm2 = vcmask 1041409   ;;  %s3056_s6 = smov 64   ;;  %vm132_vm3 = vcmask 261120   ;;  %vm2363_vm4 = vcmask 261127   ;;  %s3057_s7 = smov [#allocation2]   ;;  %vm2365_vm5 = vcmask 253952  }
   0x7   :  { %2673 = vmatprep.subr.bf16.mxu1 %v3052_v3  ;;  %2679 = vmatprep.subr.bf16.mxu0 %v3052_v3  ;;  %s2373_s8 = sshll.u32 %s3057_s7, 4  ;;  %s2374_s8 = int_to_ptr.vmem [resolvable:$true] %s2373_s8 }
   0x8   :  { %2492 = vmatmul.mubr.msk.f32.gmra.mrb[2].mxu0 %vm30_vm0, %v21_v12  ;;  %s3028_s9 = scalar_lea.vmem %s2374_s8, 32  ;;  %p3033_p1 = scmp.lt.s32.totalorder %s2374_s8, %s2374_s8 }
   0x9   :  { %2513 = vmatprep.mubr.msk.f32.mxu0 %vm3053_vm1, %v3054_v10  ;;  %p3029_p0 = scmp.ne.s32.totalorder %s2374_s8, %s3028_s9  ;;  %p3034_p2 = scmp.lt.s32.totalorder %s3028_s9, %s3028_s9 }
   0xa   :  { %2675 = vmatpush3.bf16.msra.mxu1 %v3116_v11  ;;  %2681 = vmatpush3.bf16.msra.mxu0 %v3116_v11 }
   0xb   :  { %2682 = vmatprep.subr.bf16.mxu1 %v3052_v3  ;;  %2688 = vmatprep.subr.bf16.mxu0 %v3052_v3  ;;  %p3035_p3 = por %p3034_p2, %p3033_p1 }
   0xd   :  { %2503 = vmatmul.mubr.f32.vlgmr.msra.gmra.mrb[0].mxu1 %v3054_v10  ;;  %p3036_p4 = pnand %p3035_p3, %p3029_p0 }
   0xe   :  { %2684 = vmatpush3.bf16.msra.mxu1 %v3103_v7  ;;  %2524 = vmatprep.mubr.msk.f32.mxu1 %vm3053_vm1, %v3054_v10 }
   0xf   :  { %2685 = vmatprep.subr.bf16.mxu1 %v3052_v3 }
  0x12   :  { %2687 = vmatpush3.bf16.msra.mxu1 %v3116_v11 }
  0x13   :  { %2694 = vmatprep.subr.bf16.mxu1 %v3052_v3 }
  0xd7   :  { %v2490_v14 = vpop.f32.mrb[0].mxu0 }
  0xd8   :  { %v3142_v15 = vadd.f32 %v2490_v14, %v2381_v13  ;;  %v109_v16 = vpop.f32.mrb[1].mxu0 }
  0xd9   :  { %v3148_v24 = vadd.f32 %v2381_v13, %v109_v16 }
  0xdb   :  { %v2493_v17 = vpop.f32.mrb[2].mxu0 }
  0xdc   :  { %v3144_v18 = vadd.f32 %v2493_v17, %v2381_v13  ;;  %v119_v19 = vpop.f32.mrb[3].mxu0 }
  0xdd   :  { %v3146_v20 = vadd.f32 %v2381_v13, %v119_v19 }
  0xe0   :  { %v202_v21 = vpop.f32.mrb[0].mxu1 }
  0xe1   :  { %v207_v22 = vrot.slane %v202_v21, 1  ;;  %v2504_v23 = vpop.f32.mrb[1].mxu1  ;;  %v210_v26 = vadd.f32 %v202_v21, %v3148_v24 }
  0xe3   :  { %v211_v25 = vadd.f32 %v207_v22, %v3146_v20  ;;  %v212_v30 = vsub.f32 0.0, %v210_v26 }
  0xe5   :  { %2772 = vtanh.f32 %v211_v25  ;;  %v213_v29 = vsub.f32 0.0, %v211_v25  ;;  %v214_v32 = vmul.f32 1.442695, %v212_v30 }
  0xe6   :  { %2774 = vtanh.f32 %v210_v26 }
  0xe7   :  { %v216_v31 = vmul.f32 1.442695, %v213_v29 }
  0xe9   :  { %2776 = vpow2.f32 %v216_v31 }
  0xea   :  { %2778 = vpow2.f32 %v214_v32 }
  0xef   :  { %v2773_v27 = vpop.eup %2772 }
  0xf0   :  { %232 = vrot.lane.b32.xlu0 %v2773_v27, %s3055_s2  ;;  %v2775_v28 = vpop.eup %2774 }
  0xf3   :  { %v2777_v33 = vpop.eup %2776 }
  0xf4   :  { %230 = vrot.lane.b32.xlu0 %v2775_v28, %s3055_s2  ;;  %v219_v34 = vadd.f32 1.0, %v2777_v33  ;;  %v2779_v35 = vpop.eup %2778 }
  0xf5   :  { %v218_v36 = vadd.f32 1.0, %v2779_v35 }
  0xf6   :  { %2780 = vrcp.f32 %v219_v34 }
  0xf7   :  { %2782 = vrcp.f32 %v218_v36 }
 0x100   :  { %v2781_v37 = vpop.eup %2780 }
 0x101   :  { %v2783_v40 = vpop.eup %2782  ;;  %v227_v43 = vmul.f32 0.0, %v2781_v37 }
 0x102   :  { %v226_v46 = vmul.f32 0.0, %v2783_v40 }
 0x162   :  { %v233_v38 = vpop.permute.xlu0 %232 }
 0x163   :  { %v237_v39 = vmul.f32 %v2781_v37, %v233_v38 }
 0x165   :  { %242 = vrot.lane.b32.xlu1 %v237_v39, %s3055_s2 }
 0x166   :  { %v231_v41 = vpop.permute.xlu0 %230 }
 0x167   :  { %v236_v42 = vmul.f32 %v2783_v40, %v231_v41 }
 0x169   :  { %240 = vrot.lane.b32.xlu1 %v236_v42, %s3055_s2 }
 0x1d7   :  { %v243_v44 = vpop.permute.xlu1 %242 }
 0x1d8   :  { %v247_v45 = vadd.f32 %v243_v44, %v227_v43 }
 0x1da   :  { %2784 = vtanh.f32 %v247_v45  ;;  %v362_v22 = vrot.slane %v247_v45, 7 }
 0x1db   :  { %v241_v47 = vpop.permute.xlu1 %240 }
 0x1dc   :  { %v246_v48 = vadd.f32 %v241_v47, %v226_v46 }
 0x1de   :  { %2786 = vtanh.f32 %v246_v48  ;;  %v361_v23 = vrot.slane %v246_v48, 7 }
 0x1e4   :  { %v2785_v49 = vpop.eup %2784 }
 0x1e5   :  { %254 = vrot.lane.b32.xlu0 %v2785_v49, %s3055_s2 }
 0x1e8   :  { %v2787_v50 = vpop.eup %2786 }
 0x1e9   :  { %252 = vrot.lane.b32.xlu1 %v2787_v50, %s3055_s2 }
 0x257   :  { %v255_v51 = vpop.permute.xlu0 %254 }
 0x258   :  { %v259_v52 = vmul.f32 %v2781_v37, %v255_v51 }
 0x25a   :  { %v262_v54 = vrot.slane %v259_v52, 7 }
 0x25b   :  { %v253_v53 = vpop.permute.xlu1 %252 }
 0x25c   :  { %v258_v55 = vmul.f32 %v2783_v40, %v253_v53 }
 0x25e   :  { %v264_v56 = vsel %vm263_vm2, %v262_v54, %v258_v55 }
 0x25f   :  { %265 = vrot.lane.b32.xlu0 %v264_v56, %s3056_s6 }
 0x2d1   :  { %v266_v57 = vpop.permute.xlu0 %265 }
 0x2d2   :  { %2514 = vmatmul.mubr.msk.f32.vlgmr.msra.gmra.mrb[4].mxu0 %vm132_vm3, %v266_v57 }
 0x2d3   :  { %2690 = vmatpush3.bf16.msra.mxu0 %v3103_v7  ;;  %2535 = vmatprep.mubr.msk.f32.mxu0 %vm3053_vm1, %v3054_v10 }
 0x2d4   :  { %2691 = vmatprep.subr.bf16.mxu0 %v3052_v3 }
 0x2d7   :  { %2693 = vmatpush3.bf16.msra.mxu0 %v3116_v11 }
 0x2d8   :  { %2700 = vmatprep.subr.bf16.mxu0 %v3052_v3 }
 0x3a5   :  { %v335_v58 = vpop.f32.mrb[4].mxu0 }
 0x3a6   :  { %v340_v59 = vrot.slane %v335_v58, 7  ;;  %v344_v60 = vadd.f32 %v335_v58, %v3146_v20  ;;  %v2515_v61 = vpop.f32.mrb[5].mxu0 }
 0x3a8   :  { %v343_v62 = vadd.f32 %v340_v59, %v3148_v24  ;;  %2788 = vtanh.f32 %v344_v60  ;;  %v346_v1 = vsub.f32 0.0, %v344_v60 }
 0x3aa   :  { %2790 = vtanh.f32 %v343_v62  ;;  %v345_v2 = vsub.f32 0.0, %v343_v62  ;;  %v349_v4 = vmul.f32 1.442695, %v346_v1 }
 0x3ac   :  { %v347_v5 = vmul.f32 1.442695, %v345_v2  ;;  %2792 = vpow2.f32 %v349_v4 }
 0x3ae   :  { %2794 = vpow2.f32 %v347_v5 }
 0x3b2   :  { %v2789_v63 = vpop.eup %2788 }
 0x3b3   :  { %371 = vrot.lane.b32.xlu0 %v2789_v63, %s3055_s2 }
 0x3b4   :  { %v2791_v0 = vpop.eup %2790 }
 0x3b5   :  { %369 = vrot.lane.b32.xlu1 %v2791_v0, %s3055_s2 }
 0x3b6   :  { %v2793_v6 = vpop.eup %2792 }
 0x3b7   :  { %v352_v9 = vadd.f32 1.0, %v2793_v6 }
 0x3b8   :  { %v2795_v8 = vpop.eup %2794 }
 0x3b9   :  { %v351_v12 = vadd.f32 1.0, %v2795_v8  ;;  %2796 = vrcp.f32 %v352_v9 }
 0x3bb   :  { %2798 = vrcp.f32 %v351_v12 }
 0x3c3   :  { %v2797_v13 = vpop.eup %2796 }
 0x3c4   :  { %v366_v25 = vmul.f32 %v2797_v13, %v362_v22 }
 0x3c5   :  { %v2799_v17 = vpop.eup %2798 }
 0x3c6   :  { %v365_v28 = vmul.f32 %v2799_v17, %v361_v23 }
 0x425   :  { %v372_v14 = vpop.permute.xlu0 %371 }
 0x426   :  { %v376_v16 = vmul.f32 %v2797_v13, %v372_v14 }
 0x427   :  { %v370_v19 = vpop.permute.xlu1 %369 }
 0x428   :  { %v375_v21 = vmul.f32 %v2799_v17, %v370_v19  ;;  %381 = vrot.lane.b32.xlu0 %v376_v16, %s3055_s2 }
 0x42a   :  { %379 = vrot.lane.b32.xlu1 %v375_v21, %s3055_s2 }
 0x49a   :  { %v382_v26 = vpop.permute.xlu0 %381 }
 0x49b   :  { %v386_v27 = vadd.f32 %v382_v26, %v366_v25 }
 0x49c   :  { %v380_v29 = vpop.permute.xlu1 %379 }
 0x49d   :  { %2800 = vtanh.f32 %v386_v27  ;;  %v385_v30 = vadd.f32 %v380_v29, %v365_v28  ;;  %v501_v63 = vrot.slane %v386_v27, 7 }
 0x49f   :  { %2802 = vtanh.f32 %v385_v30  ;;  %v500_v62 = vrot.slane %v385_v30, 7 }
 0x4a7   :  { %v2801_v31 = vpop.eup %2800 }
 0x4a8   :  { %393 = vrot.lane.b32.xlu0 %v2801_v31, %s3055_s2 }
 0x4a9   :  { %v2803_v32 = vpop.eup %2802 }
 0x4aa   :  { %391 = vrot.lane.b32.xlu1 %v2803_v32, %s3055_s2 }
 0x51a   :  { %v394_v33 = vpop.permute.xlu0 %393 }
 0x51b   :  { %v398_v36 = vmul.f32 %v2797_v13, %v394_v33 }
 0x51c   :  { %v392_v34 = vpop.permute.xlu1 %391 }
 0x51d   :  { %v397_v35 = vmul.f32 %v2799_v17, %v392_v34 }
 0x51f   :  { %v401_v37 = vrot.slane %v397_v35, 1 }
 0x521   :  { %v402_v38 = vsel %vm263_vm2, %v398_v36, %v401_v37 }
 0x522   :  { %403 = vrot.lane.b32.xlu1 %v402_v38, %s3056_s6 }
 0x594   :  { %v404_v39 = vpop.permute.xlu1 %403 }
 0x595   :  { %2525 = vmatmul.mubr.msk.f32.vlgmr.msra.gmra.mrb[2].mxu1 %vm132_vm3, %v404_v39 }
 0x596   :  { %2696 = vmatpush3.bf16.msra.mxu1 %v3103_v7  ;;  %2546 = vmatprep.mubr.msk.f32.mxu1 %vm3053_vm1, %v3054_v10 }
 0x597   :  { %2697 = vmatprep.subr.bf16.mxu1 %v3052_v3 }
 0x59a   :  { %2699 = vmatpush3.bf16.msra.mxu1 %v3116_v11 }
 0x59b   :  { %2706 = vmatprep.subr.bf16.mxu1 %v3052_v3 }
 0x668   :  { %v473_v40 = vpop.f32.mrb[2].mxu1 }
 0x669   :  { %v478_v41 = vrot.slane %v473_v40, 6  ;;  %v479_v42 = vrot.slane %v473_v40, 7  ;;  %v2526_v43 = vpop.f32.mrb[3].mxu1 }
 0x66b   :  { %v482_v44 = vadd.f32 %v478_v41, %v3148_v24  ;;  %v483_v45 = vadd.f32 %v479_v42, %v3146_v20 }
 0x66d   :  { %2804 = vtanh.f32 %v482_v44  ;;  %v484_v48 = vsub.f32 0.0, %v482_v44  ;;  %v485_v49 = vsub.f32 0.0, %v483_v45 }
 0x66e   :  { %2806 = vtanh.f32 %v483_v45 }
 0x66f   :  { %v486_v50 = vmul.f32 1.442695, %v484_v48  ;;  %v488_v51 = vmul.f32 1.442695, %v485_v49 }
 0x671   :  { %2808 = vpow2.f32 %v486_v50 }
 0x672   :  { %2810 = vpow2.f32 %v488_v51 }
 0x677   :  { %v2805_v46 = vpop.eup %2804 }
 0x678   :  { %v2807_v47 = vpop.eup %2806  ;;  %508 = vrot.lane.b32.xlu0 %v2805_v46, %s3055_s2 }
 0x679   :  { %510 = vrot.lane.b32.xlu1 %v2807_v47, %s3055_s2 }
 0x67b   :  { %v2809_v52 = vpop.eup %2808 }
 0x67c   :  { %v2811_v53 = vpop.eup %2810  ;;  %v490_v54 = vadd.f32 1.0, %v2809_v52 }
 0x67d   :  { %v491_v55 = vadd.f32 1.0, %v2811_v53 }
 0x67e   :  { %2812 = vrcp.f32 %v490_v54 }
 0x67f   :  { %2814 = vrcp.f32 %v491_v55 }
 0x688   :  { %v2813_v56 = vpop.eup %2812 }
 0x689   :  { %v2815_v58 = vpop.eup %2814  ;;  %v504_v0 = vmul.f32 %v2813_v56, %v500_v62 }
 0x68a   :  { %v505_v1 = vmul.f32 %v2815_v58, %v501_v63 }
 0x6ea   :  { %v509_v57 = vpop.permute.xlu0 %508 }
 0x6eb   :  { %v511_v59 = vpop.permute.xlu1 %510  ;;  %v514_v60 = vmul.f32 %v2813_v56, %v509_v57 }
 0x6ec   :  { %v515_v61 = vmul.f32 %v2815_v58, %v511_v59 }
 0x6ed   :  { %518 = vrot.lane.b32.xlu0 %v514_v60, %s3055_s2 }
 0x6ee   :  { %520 = vrot.lane.b32.xlu1 %v515_v61, %s3055_s2 }
 0x75f   :  { %v519_v2 = vpop.permute.xlu0 %518 }
 0x760   :  { %v521_v4 = vpop.permute.xlu1 %520  ;;  %v524_v5 = vadd.f32 %v519_v2, %v504_v0 }
 0x761   :  { %v525_v6 = vadd.f32 %v521_v4, %v505_v1 }
 0x762   :  { %2816 = vtanh.f32 %v524_v5  ;;  %v640_v46 = vrot.slane %v524_v5, 7 }
 0x763   :  { %2818 = vtanh.f32 %v525_v6  ;;  %v641_v47 = vrot.slane %v525_v6, 7 }
 0x76c   :  { %v2817_v8 = vpop.eup %2816 }
 0x76d   :  { %v2819_v9 = vpop.eup %2818  ;;  %530 = vrot.lane.b32.xlu0 %v2817_v8, %s3055_s2 }
 0x76e   :  { %532 = vrot.lane.b32.xlu1 %v2819_v9, %s3055_s2 }
 0x7df   :  { %v531_v12 = vpop.permute.xlu0 %530 }
 0x7e0   :  { %v533_v13 = vpop.permute.xlu1 %532  ;;  %v536_v14 = vmul.f32 %v2813_v56, %v531_v12 }
 0x7e1   :  { %v537_v16 = vmul.f32 %v2815_v58, %v533_v13 }
 0x7e2   :  { %v540_v17 = vrot.slane %v536_v14, 2 }
 0x7e3   :  { %v541_v19 = vrot.slane %v537_v16, 1 }
 0x7e5   :  { %v542_v21 = vsel %vm263_vm2, %v541_v19, %v540_v17 }
 0x7e6   :  { %543 = vrot.lane.b32.xlu0 %v542_v21, %s3056_s6 }
 0x858   :  { %v544_v22 = vpop.permute.xlu0 %543 }
 0x859   :  { %2536 = vmatmul.mubr.msk.f32.vlgmr.msra.gmra.mrb[6].mxu0 %vm132_vm3, %v544_v22 }
 0x85a   :  { %2702 = vmatpush3.bf16.msra.mxu0 %v3103_v7  ;;  %2557 = vmatprep.mubr.msk.f32.mxu0 %vm3053_vm1, %v3054_v10 }
 0x85b   :  { %2703 = vmatprep.subr.bf16.mxu0 %v3052_v3 }
 0x85e   :  { %2705 = vmatpush3.bf16.msra.mxu0 %v3116_v11 }
 0x85f   :  { %2712 = vmatprep.subr.bf16.mxu0 %v3052_v3 }
 0x92c   :  { %v613_v23 = vpop.f32.mrb[6].mxu0 }
 0x92d   :  { %v618_v25 = vrot.slane %v613_v23, 5  ;;  %v619_v26 = vrot.slane %v613_v23, 6  ;;  %v2537_v27 = vpop.f32.mrb[7].mxu0 }
 0x92f   :  { %v622_v28 = vadd.f32 %v618_v25, %v3148_v24  ;;  %v623_v29 = vadd.f32 %v619_v26, %v3146_v20 }
 0x931   :  { %2820 = vtanh.f32 %v622_v28  ;;  %v624_v32 = vsub.f32 0.0, %v622_v28  ;;  %v625_v33 = vsub.f32 0.0, %v623_v29 }
 0x932   :  { %2822 = vtanh.f32 %v623_v29 }
 0x933   :  { %v626_v34 = vmul.f32 1.442695, %v624_v32  ;;  %v628_v35 = vmul.f32 1.442695, %v625_v33 }
 0x935   :  { %2824 = vpow2.f32 %v626_v34 }
 0x936   :  { %2826 = vpow2.f32 %v628_v35 }
 0x93b   :  { %v2821_v30 = vpop.eup %2820 }
 0x93c   :  { %v2823_v31 = vpop.eup %2822  ;;  %648 = vrot.lane.b32.xlu1 %v2821_v30, %s3055_s2 }
 0x93d   :  { %650 = vrot.lane.b32.xlu0 %v2823_v31, %s3055_s2 }
 0x93f   :  { %v2825_v36 = vpop.eup %2824 }
 0x940   :  { %v2827_v37 = vpop.eup %2826  ;;  %v630_v38 = vadd.f32 1.0, %v2825_v36 }
 0x941   :  { %v631_v39 = vadd.f32 1.0, %v2827_v37 }
 0x942   :  { %2828 = vrcp.f32 %v630_v38 }
 0x943   :  { %2830 = vrcp.f32 %v631_v39 }
 0x94c   :  { %v2829_v40 = vpop.eup %2828 }
 0x94d   :  { %v2831_v42 = vpop.eup %2830  ;;  %v644_v48 = vmul.f32 %v2829_v40, %v640_v46 }
 0x94e   :  { %v645_v49 = vmul.f32 %v2831_v42, %v641_v47 }
 0x9ae   :  { %v649_v41 = vpop.permute.xlu1 %648 }
 0x9af   :  { %v651_v43 = vpop.permute.xlu0 %650  ;;  %v654_v44 = vmul.f32 %v2829_v40, %v649_v41 }
 0x9b0   :  { %v655_v45 = vmul.f32 %v2831_v42, %v651_v43 }
 0x9b1   :  { %658 = vrot.lane.b32.xlu1 %v654_v44, %s3055_s2 }
 0x9b2   :  { %660 = vrot.lane.b32.xlu0 %v655_v45, %s3055_s2 }
 0xa23   :  { %v659_v50 = vpop.permute.xlu1 %658 }
 0xa24   :  { %v661_v51 = vpop.permute.xlu0 %660  ;;  %v664_v52 = vadd.f32 %v659_v50, %v644_v48 }
 0xa25   :  { %v665_v53 = vadd.f32 %v661_v51, %v645_v49 }
 0xa26   :  { %2832 = vtanh.f32 %v664_v52  ;;  %v780_v30 = vrot.slane %v664_v52, 7 }
 0xa27   :  { %2834 = vtanh.f32 %v665_v53  ;;  %v781_v31 = vrot.slane %v665_v53, 7 }
 0xa30   :  { %v2833_v54 = vpop.eup %2832 }
 0xa31   :  { %v2835_v55 = vpop.eup %2834  ;;  %670 = vrot.lane.b32.xlu1 %v2833_v54, %s3055_s2 }
 0xa32   :  { %672 = vrot.lane.b32.xlu0 %v2835_v55, %s3055_s2 }
 0xaa3   :  { %v671_v56 = vpop.permute.xlu1 %670 }
 0xaa4   :  { %v673_v57 = vpop.permute.xlu0 %672  ;;  %v676_v58 = vmul.f32 %v2829_v40, %v671_v56 }
 0xaa5   :  { %v677_v59 = vmul.f32 %v2831_v42, %v673_v57 }
 0xaa6   :  { %v680_v60 = vrot.slane %v676_v58, 3 }
 0xaa7   :  { %v681_v61 = vrot.slane %v677_v59, 2 }
 0xaa9   :  { %v682_v62 = vsel %vm263_vm2, %v681_v61, %v680_v60 }
 0xaaa   :  { %683 = vrot.lane.b32.xlu1 %v682_v62, %s3056_s6 }
 0xb1c   :  { %v684_v63 = vpop.permute.xlu1 %683 }
 0xb1d   :  { %2547 = vmatmul.mubr.msk.f32.vlgmr.msra.gmra.mrb[4].mxu1 %vm132_vm3, %v684_v63 }
 0xb1e   :  { %2708 = vmatpush3.bf16.msra.mxu1 %v3103_v7  ;;  %2568 = vmatprep.mubr.msk.f32.mxu1 %vm3053_vm1, %v3054_v10 }
 0xb1f   :  { %2709 = vmatprep.subr.bf16.mxu1 %v3052_v3 }
 0xb22   :  { %2711 = vmatpush3.bf16.msra.mxu1 %v3116_v11 }
 0xb23   :  { %2718 = vmatprep.subr.bf16.mxu1 %v3052_v3 }
 0xbf0   :  { %v753_v0 = vpop.f32.mrb[4].mxu1 }
 0xbf1   :  { %v758_v1 = vrot.slane %v753_v0, 4  ;;  %v759_v2 = vrot.slane %v753_v0, 5  ;;  %v2548_v4 = vpop.f32.mrb[5].mxu1 }
 0xbf3   :  { %v762_v5 = vadd.f32 %v758_v1, %v3148_v24  ;;  %v763_v6 = vadd.f32 %v759_v2, %v3146_v20 }
 0xbf5   :  { %2836 = vtanh.f32 %v762_v5  ;;  %v764_v12 = vsub.f32 0.0, %v762_v5  ;;  %v765_v13 = vsub.f32 0.0, %v763_v6 }
 0xbf6   :  { %2838 = vtanh.f32 %v763_v6 }
 0xbf7   :  { %v766_v14 = vmul.f32 1.442695, %v764_v12  ;;  %v768_v16 = vmul.f32 1.442695, %v765_v13 }
 0xbf9   :  { %2840 = vpow2.f32 %v766_v14 }
 0xbfa   :  { %2842 = vpow2.f32 %v768_v16 }
 0xbff   :  { %v2837_v8 = vpop.eup %2836 }
 0xc00   :  { %v2839_v9 = vpop.eup %2838  ;;  %788 = vrot.lane.b32.xlu0 %v2837_v8, %s3055_s2 }
 0xc01   :  { %790 = vrot.lane.b32.xlu1 %v2839_v9, %s3055_s2 }
 0xc03   :  { %v2841_v17 = vpop.eup %2840 }
 0xc04   :  { %v2843_v19 = vpop.eup %2842  ;;  %v770_v21 = vadd.f32 1.0, %v2841_v17 }
 0xc05   :  { %v771_v22 = vadd.f32 1.0, %v2843_v19 }
 0xc06   :  { %2844 = vrcp.f32 %v770_v21 }
 0xc07   :  { %2846 = vrcp.f32 %v771_v22 }
 0xc10   :  { %v2845_v23 = vpop.eup %2844 }
 0xc11   :  { %v2847_v26 = vpop.eup %2846  ;;  %v784_v32 = vmul.f32 %v2845_v23, %v780_v30 }
 0xc12   :  { %v785_v33 = vmul.f32 %v2847_v26, %v781_v31 }
 0xc72   :  { %v789_v25 = vpop.permute.xlu0 %788 }
 0xc73   :  { %v791_v27 = vpop.permute.xlu1 %790  ;;  %v794_v28 = vmul.f32 %v2845_v23, %v789_v25 }
 0xc74   :  { %v795_v29 = vmul.f32 %v2847_v26, %v791_v27 }
 0xc75   :  { %798 = vrot.lane.b32.xlu0 %v794_v28, %s3055_s2 }
 0xc76   :  { %800 = vrot.lane.b32.xlu1 %v795_v29, %s3055_s2 }
 0xce7   :  { %v799_v34 = vpop.permute.xlu0 %798 }
 0xce8   :  { %v801_v35 = vpop.permute.xlu1 %800  ;;  %v804_v36 = vadd.f32 %v799_v34, %v784_v32 }
 0xce9   :  { %v805_v37 = vadd.f32 %v801_v35, %v785_v33 }
 0xcea   :  { %2848 = vtanh.f32 %v804_v36  ;;  %v920_v8 = vrot.slane %v804_v36, 7 }
 0xceb   :  { %2850 = vtanh.f32 %v805_v37  ;;  %v921_v9 = vrot.slane %v805_v37, 7 }
 0xcf4   :  { %v2849_v38 = vpop.eup %2848 }
 0xcf5   :  { %v2851_v39 = vpop.eup %2850  ;;  %810 = vrot.lane.b32.xlu0 %v2849_v38, %s3055_s2 }
 0xcf6   :  { %812 = vrot.lane.b32.xlu1 %v2851_v39, %s3055_s2 }
 0xd67   :  { %v811_v40 = vpop.permute.xlu0 %810 }
 0xd68   :  { %v813_v41 = vpop.permute.xlu1 %812  ;;  %v816_v42 = vmul.f32 %v2845_v23, %v811_v40 }
 0xd69   :  { %v817_v43 = vmul.f32 %v2847_v26, %v813_v41 }
 0xd6a   :  { %v820_v44 = vrot.slane %v816_v42, 4 }
 0xd6b   :  { %v821_v45 = vrot.slane %v817_v43, 3 }
 0xd6d   :  { %v822_v46 = vsel %vm263_vm2, %v821_v45, %v820_v44 }
 0xd6e   :  { %823 = vrot.lane.b32.xlu0 %v822_v46, %s3056_s6 }
 0xde0   :  { %v824_v47 = vpop.permute.xlu0 %823 }
 0xde1   :  { %2558 = vmatmul.mubr.msk.f32.vlgmr.msra.gmra.mrb[8].mxu0 %vm132_vm3, %v824_v47 }
 0xde2   :  { %2714 = vmatpush3.bf16.msra.mxu0 %v3103_v7  ;;  %2579 = vmatprep.mubr.msk.f32.mxu0 %vm3053_vm1, %v3054_v10 }
 0xde3   :  { %2715 = vmatprep.subr.bf16.mxu0 %v3052_v3 }
 0xde6   :  { %2717 = vmatpush3.bf16.msra.mxu0 %v3116_v11 }
 0xde7   :  { %2724 = vmatprep.subr.bf16.mxu0 %v3052_v3 }
 0xeb4   :  { %v893_v48 = vpop.f32.mrb[8].mxu0 }
 0xeb5   :  { %v898_v49 = vrot.slane %v893_v48, 3  ;;  %v899_v50 = vrot.slane %v893_v48, 4  ;;  %v2559_v51 = vpop.f32.mrb[9].mxu0 }
 0xeb7   :  { %v902_v52 = vadd.f32 %v898_v49, %v3148_v24  ;;  %v903_v53 = vadd.f32 %v899_v50, %v3146_v20 }
 0xeb9   :  { %2852 = vtanh.f32 %v902_v52  ;;  %v904_v56 = vsub.f32 0.0, %v902_v52  ;;  %v905_v57 = vsub.f32 0.0, %v903_v53 }
 0xeba   :  { %2854 = vtanh.f32 %v903_v53 }
 0xebb   :  { %v906_v58 = vmul.f32 1.442695, %v904_v56  ;;  %v908_v59 = vmul.f32 1.442695, %v905_v57 }
 0xebd   :  { %2856 = vpow2.f32 %v906_v58 }
 0xebe   :  { %2858 = vpow2.f32 %v908_v59 }
 0xec3   :  { %v2853_v54 = vpop.eup %2852 }
 0xec4   :  { %v2855_v55 = vpop.eup %2854  ;;  %928 = vrot.lane.b32.xlu1 %v2853_v54, %s3055_s2 }
 0xec5   :  { %930 = vrot.lane.b32.xlu0 %v2855_v55, %s3055_s2 }
 0xec7   :  { %v2857_v60 = vpop.eup %2856 }
 0xec8   :  { %v2859_v61 = vpop.eup %2858  ;;  %v910_v62 = vadd.f32 1.0, %v2857_v60 }
 0xec9   :  { %v911_v63 = vadd.f32 1.0, %v2859_v61 }
 0xeca   :  { %2860 = vrcp.f32 %v910_v62 }
 0xecb   :  { %2862 = vrcp.f32 %v911_v63 }
 0xed4   :  { %v2861_v0 = vpop.eup %2860 }
 0xed5   :  { %v2863_v2 = vpop.eup %2862  ;;  %v924_v12 = vmul.f32 %v2861_v0, %v920_v8 }
 0xed6   :  { %v925_v13 = vmul.f32 %v2863_v2, %v921_v9 }
 0xf36   :  { %v929_v1 = vpop.permute.xlu1 %928 }
 0xf37   :  { %v931_v4 = vpop.permute.xlu0 %930  ;;  %v934_v5 = vmul.f32 %v2861_v0, %v929_v1 }
 0xf38   :  { %v935_v6 = vmul.f32 %v2863_v2, %v931_v4 }
 0xf39   :  { %938 = vrot.lane.b32.xlu1 %v934_v5, %s3055_s2 }
 0xf3a   :  { %940 = vrot.lane.b32.xlu0 %v935_v6, %s3055_s2 }
 0xfab   :  { %v939_v14 = vpop.permute.xlu1 %938 }
 0xfac   :  { %v941_v16 = vpop.permute.xlu0 %940  ;;  %v944_v17 = vadd.f32 %v939_v14, %v924_v12 }
 0xfad   :  { %v945_v19 = vadd.f32 %v941_v16, %v925_v13 }
 0xfae   :  { %2864 = vtanh.f32 %v944_v17  ;;  %v1060_v54 = vrot.slane %v944_v17, 7 }
 0xfaf   :  { %2866 = vtanh.f32 %v945_v19  ;;  %v1061_v55 = vrot.slane %v945_v19, 7 }
 0xfb8   :  { %v2865_v21 = vpop.eup %2864 }
 0xfb9   :  { %v2867_v22 = vpop.eup %2866  ;;  %950 = vrot.lane.b32.xlu1 %v2865_v21, %s3055_s2 }
 0xfba   :  { %952 = vrot.lane.b32.xlu0 %v2867_v22, %s3055_s2 }
0x102b   :  { %v951_v23 = vpop.permute.xlu1 %950 }
0x102c   :  { %v953_v25 = vpop.permute.xlu0 %952  ;;  %v956_v26 = vmul.f32 %v2861_v0, %v951_v23 }
0x102d   :  { %v957_v27 = vmul.f32 %v2863_v2, %v953_v25 }
0x102e   :  { %v960_v28 = vrot.slane %v956_v26, 5 }
0x102f   :  { %v961_v29 = vrot.slane %v957_v27, 4 }
0x1031   :  { %v962_v30 = vsel %vm263_vm2, %v961_v29, %v960_v28 }
0x1032   :  { %963 = vrot.lane.b32.xlu1 %v962_v30, %s3056_s6 }
0x10a4   :  { %v964_v31 = vpop.permute.xlu1 %963 }
0x10a5   :  { %2569 = vmatmul.mubr.msk.f32.vlgmr.msra.gmra.mrb[6].mxu1 %vm132_vm3, %v964_v31 }
0x10a6   :  { %2720 = vmatpush3.bf16.msra.mxu1 %v3103_v7  ;;  %2590 = vmatprep.mubr.msk.f32.mxu1 %vm3053_vm1, %v3054_v10 }
0x10a7   :  { %2721 = vmatprep.subr.bf16.mxu1 %v3052_v3 }
0x10aa   :  { %2723 = vmatpush3.bf16.msra.mxu1 %v3116_v11 }
0x10ab   :  { %2730 = vmatprep.subr.bf16.mxu1 %v3052_v3 }
0x1178   :  { %v1033_v32 = vpop.f32.mrb[6].mxu1 }
0x1179   :  { %v1038_v33 = vrot.slane %v1033_v32, 2  ;;  %v1039_v34 = vrot.slane %v1033_v32, 3  ;;  %v2570_v35 = vpop.f32.mrb[7].mxu1 }
0x117b   :  { %v1042_v36 = vadd.f32 %v1038_v33, %v3148_v24  ;;  %v1043_v37 = vadd.f32 %v1039_v34, %v3146_v20 }
0x117d   :  { %2868 = vtanh.f32 %v1042_v36  ;;  %v1044_v40 = vsub.f32 0.0, %v1042_v36  ;;  %v1045_v41 = vsub.f32 0.0, %v1043_v37 }
0x117e   :  { %2870 = vtanh.f32 %v1043_v37 }
0x117f   :  { %v1046_v42 = vmul.f32 1.442695, %v1044_v40  ;;  %v1048_v43 = vmul.f32 1.442695, %v1045_v41 }
0x1181   :  { %2872 = vpow2.f32 %v1046_v42 }
0x1182   :  { %2874 = vpow2.f32 %v1048_v43 }
0x1187   :  { %v2869_v38 = vpop.eup %2868 }
0x1188   :  { %v2871_v39 = vpop.eup %2870  ;;  %1068 = vrot.lane.b32.xlu0 %v2869_v38, %s3055_s2 }
0x1189   :  { %1070 = vrot.lane.b32.xlu1 %v2871_v39, %s3055_s2 }
0x118b   :  { %v2873_v44 = vpop.eup %2872 }
0x118c   :  { %v2875_v45 = vpop.eup %2874  ;;  %v1050_v46 = vadd.f32 1.0, %v2873_v44 }
0x118d   :  { %v1051_v47 = vadd.f32 1.0, %v2875_v45 }
0x118e   :  { %2876 = vrcp.f32 %v1050_v46 }
0x118f   :  { %2878 = vrcp.f32 %v1051_v47 }
0x1198   :  { %v2877_v48 = vpop.eup %2876 }
0x1199   :  { %v2879_v50 = vpop.eup %2878  ;;  %v1064_v56 = vmul.f32 %v2877_v48, %v1060_v54 }
0x119a   :  { %v1065_v57 = vmul.f32 %v2879_v50, %v1061_v55 }
0x11fa   :  { %v1069_v49 = vpop.permute.xlu0 %1068 }
0x11fb   :  { %v1071_v51 = vpop.permute.xlu1 %1070  ;;  %v1074_v52 = vmul.f32 %v2877_v48, %v1069_v49 }
0x11fc   :  { %v1075_v53 = vmul.f32 %v2879_v50, %v1071_v51 }
0x11fd   :  { %1078 = vrot.lane.b32.xlu0 %v1074_v52, %s3055_s2 }
0x11fe   :  { %1080 = vrot.lane.b32.xlu1 %v1075_v53, %s3055_s2 }
0x126f   :  { %v1079_v58 = vpop.permute.xlu0 %1078 }
0x1270   :  { %v1081_v59 = vpop.permute.xlu1 %1080  ;;  %v1084_v60 = vadd.f32 %v1079_v58, %v1064_v56 }
0x1271   :  { %v1085_v61 = vadd.f32 %v1081_v59, %v1065_v57 }
0x1272   :  { %2880 = vtanh.f32 %v1084_v60  ;;  %v1200_v36 = vrot.slane %v1084_v60, 7 }
0x1273   :  { %2882 = vtanh.f32 %v1085_v61  ;;  %v1201_v37 = vrot.slane %v1085_v61, 7 }
0x127c   :  { %v2881_v62 = vpop.eup %2880 }
0x127d   :  { %v2883_v63 = vpop.eup %2882  ;;  %1090 = vrot.lane.b32.xlu0 %v2881_v62, %s3055_s2 }
0x127e   :  { %1092 = vrot.lane.b32.xlu1 %v2883_v63, %s3055_s2 }
0x12ef   :  { %v1091_v0 = vpop.permute.xlu0 %1090 }
0x12f0   :  { %v1093_v1 = vpop.permute.xlu1 %1092  ;;  %v1096_v2 = vmul.f32 %v2877_v48, %v1091_v0 }
0x12f1   :  { %v1097_v4 = vmul.f32 %v2879_v50, %v1093_v1 }
0x12f2   :  { %v1100_v5 = vrot.slane %v1096_v2, 6 }
0x12f3   :  { %v1101_v6 = vrot.slane %v1097_v4, 5 }
0x12f5   :  { %v1102_v8 = vsel %vm263_vm2, %v1101_v6, %v1100_v5 }
0x12f6   :  { %1103 = vrot.lane.b32.xlu0 %v1102_v8, %s3056_s6 }
0x1368   :  { %v1104_v9 = vpop.permute.xlu0 %1103 }
0x1369   :  { %2580 = vmatmul.mubr.msk.f32.vlgmr.msra.gmra.mrb[10].mxu0 %vm132_vm3, %v1104_v9 }
0x136a   :  { %2726 = vmatpush3.bf16.msra.mxu0 %v3103_v7  ;;  %2601 = vmatprep.mubr.msk.f32.mxu0 %vm3053_vm1, %v3054_v10 }
0x136b   :  { %2727 = vmatprep.subr.bf16.mxu0 %v3052_v3 }
0x136e   :  { %2729 = vmatpush3.bf16.msra.mxu0 %v3116_v11 }
0x136f   :  { %2736 = vmatprep.subr.bf16.mxu0 %v3052_v3 }
0x143c   :  { %v1173_v12 = vpop.f32.mrb[10].mxu0 }
0x143d   :  { %v1178_v13 = vrot.slane %v1173_v12, 1  ;;  %v1179_v14 = vrot.slane %v1173_v12, 2  ;;  %v2581_v16 = vpop.f32.mrb[11].mxu0 }
0x143f   :  { %v1182_v17 = vadd.f32 %v1178_v13, %v3148_v24  ;;  %v1183_v19 = vadd.f32 %v1179_v14, %v3146_v20 }
0x1441   :  { %2884 = vtanh.f32 %v1182_v17  ;;  %v1184_v23 = vsub.f32 0.0, %v1182_v17  ;;  %v1185_v25 = vsub.f32 0.0, %v1183_v19 }
0x1442   :  { %2886 = vtanh.f32 %v1183_v19 }
0x1443   :  { %v1186_v26 = vmul.f32 1.442695, %v1184_v23  ;;  %v1188_v27 = vmul.f32 1.442695, %v1185_v25 }
0x1445   :  { %2888 = vpow2.f32 %v1186_v26 }
0x1446   :  { %2890 = vpow2.f32 %v1188_v27 }
0x144b   :  { %v2885_v21 = vpop.eup %2884 }
0x144c   :  { %v2887_v22 = vpop.eup %2886  ;;  %1208 = vrot.lane.b32.xlu1 %v2885_v21, %s3055_s2 }
0x144d   :  { %1210 = vrot.lane.b32.xlu0 %v2887_v22, %s3055_s2 }
0x144f   :  { %v2889_v28 = vpop.eup %2888 }
0x1450   :  { %v2891_v29 = vpop.eup %2890  ;;  %v1190_v30 = vadd.f32 1.0, %v2889_v28 }
0x1451   :  { %v1191_v24 = vadd.f32 1.0, %v2891_v29 }
0x1452   :  { %2892 = vrcp.f32 %v1190_v30 }
0x1453   :  { %2894 = vrcp.f32 %v1191_v24 }
0x145c   :  { %v2893_v20 = vpop.eup %2892 }
0x145d   :  { %v2895_v32 = vpop.eup %2894  ;;  %v1204_v38 = vmul.f32 %v2893_v20, %v1200_v36 }
0x145e   :  { %v1205_v39 = vmul.f32 %v2895_v32, %v1201_v37 }
0x14be   :  { %v1209_v31 = vpop.permute.xlu1 %1208 }
0x14bf   :  { %v1211_v33 = vpop.permute.xlu0 %1210  ;;  %v1214_v34 = vmul.f32 %v2893_v20, %v1209_v31 }
0x14c0   :  { %v1215_v35 = vmul.f32 %v2895_v32, %v1211_v33 }
0x14c1   :  { %1218 = vrot.lane.b32.xlu1 %v1214_v34, %s3055_s2 }
0x14c2   :  { %1220 = vrot.lane.b32.xlu0 %v1215_v35, %s3055_s2 }
0x1533   :  { %v1219_v40 = vpop.permute.xlu1 %1218 }
0x1534   :  { %v1221_v41 = vpop.permute.xlu0 %1220  ;;  %v1224_v42 = vadd.f32 %v1219_v40, %v1204_v38 }
0x1535   :  { %v1225_v43 = vadd.f32 %v1221_v41, %v1205_v39 }
0x1536   :  { %2896 = vtanh.f32 %v1224_v42  ;;  %v1339_v16 = vrot.slane %v1224_v42, 7 }
0x1537   :  { %2898 = vtanh.f32 %v1225_v43  ;;  %v1340_v17 = vrot.slane %v1225_v43, 7 }
0x1540   :  { %v2897_v44 = vpop.eup %2896 }
0x1541   :  { %v2899_v45 = vpop.eup %2898  ;;  %1230 = vrot.lane.b32.xlu1 %v2897_v44, %s3055_s2 }
0x1542   :  { %1232 = vrot.lane.b32.xlu0 %v2899_v45, %s3055_s2 }
0x15b3   :  { %v1231_v46 = vpop.permute.xlu1 %1230 }
0x15b4   :  { %v1233_v47 = vpop.permute.xlu0 %1232  ;;  %v1236_v48 = vmul.f32 %v2893_v20, %v1231_v46 }
0x15b5   :  { %v1237_v49 = vmul.f32 %v2895_v32, %v1233_v47 }
0x15b6   :  { %v1240_v50 = vrot.slane %v1236_v48, 7 }
0x15b7   :  { %v1241_v51 = vrot.slane %v1237_v49, 6 }
0x15b9   :  { %v1242_v52 = vsel %vm263_vm2, %v1241_v51, %v1240_v50 }
0x15ba   :  { %1243 = vrot.lane.b32.xlu1 %v1242_v52, %s3056_s6 }
0x162c   :  { %v1244_v53 = vpop.permute.xlu1 %1243 }
0x162d   :  { %2591 = vmatmul.mubr.msk.f32.vlgmr.msra.gmra.mrb[8].mxu1 %vm132_vm3, %v1244_v53 }
0x162e   :  { %2732 = vmatpush3.bf16.msra.mxu1 %v3103_v7  ;;  %2612 = vmatprep.mubr.msk.f32.mxu1 %vm3053_vm1, %v3054_v10 }
0x162f   :  { %2733 = vmatprep.subr.bf16.mxu1 %v3052_v3 }
0x1632   :  { %2735 = vmatpush3.bf16.msra.mxu1 %v3116_v11 }
0x1633   :  { %2742 = vmatprep.subr.bf16.mxu1 %v3052_v3 }
0x1700   :  { %v1313_v54 = vpop.f32.mrb[8].mxu1 }
0x1701   :  { %v1318_v55 = vrot.slane %v1313_v54, 1  ;;  %v1321_v56 = vadd.f32 %v1313_v54, %v3142_v15  ;;  %v2592_v57 = vpop.f32.mrb[9].mxu1 }
0x1703   :  { %v1322_v58 = vadd.f32 %v1318_v55, %v3144_v18  ;;  %2900 = vtanh.f32 %v1321_v56  ;;  %v1323_v61 = vsub.f32 0.0, %v1321_v56 }
0x1705   :  { %2902 = vtanh.f32 %v1322_v58  ;;  %v1324_v62 = vsub.f32 0.0, %v1322_v58  ;;  %v1325_v63 = vmul.f32 1.442695, %v1323_v61 }
0x1707   :  { %v1327_v0 = vmul.f32 1.442695, %v1324_v62  ;;  %2904 = vpow2.f32 %v1325_v63 }
0x1709   :  { %2906 = vpow2.f32 %v1327_v0 }
0x170d   :  { %v2901_v59 = vpop.eup %2900 }
0x170e   :  { %1347 = vrot.lane.b32.xlu1 %v2901_v59, %s3055_s2 }
0x170f   :  { %v2903_v60 = vpop.eup %2902 }
0x1710   :  { %1349 = vrot.lane.b32.xlu0 %v2903_v60, %s3055_s2 }
0x1711   :  { %v2905_v1 = vpop.eup %2904 }
0x1712   :  { %v1329_v4 = vadd.f32 1.0, %v2905_v1 }
0x1713   :  { %v2907_v2 = vpop.eup %2906 }
0x1714   :  { %v1330_v5 = vadd.f32 1.0, %v2907_v2  ;;  %2908 = vrcp.f32 %v1329_v4 }
0x1716   :  { %2910 = vrcp.f32 %v1330_v5 }
0x171e   :  { %v2909_v6 = vpop.eup %2908 }
0x171f   :  { %v1343_v19 = vmul.f32 %v2909_v6, %v1339_v16 }
0x1720   :  { %v2911_v12 = vpop.eup %2910 }
0x1721   :  { %v1344_v23 = vmul.f32 %v2911_v12, %v1340_v17 }
0x1780   :  { %v1348_v8 = vpop.permute.xlu1 %1347 }
0x1781   :  { %v1353_v9 = vmul.f32 %v2909_v6, %v1348_v8 }
0x1782   :  { %v1350_v13 = vpop.permute.xlu0 %1349 }
0x1783   :  { %v1354_v14 = vmul.f32 %v2911_v12, %v1350_v13  ;;  %1357 = vrot.lane.b32.xlu1 %v1353_v9, %s3055_s2 }
0x1785   :  { %1359 = vrot.lane.b32.xlu0 %v1354_v14, %s3055_s2 }
0x17f5   :  { %v1358_v21 = vpop.permute.xlu1 %1357 }
0x17f6   :  { %v1363_v22 = vadd.f32 %v1358_v21, %v1343_v19 }
0x17f7   :  { %v1360_v25 = vpop.permute.xlu0 %1359 }
0x17f8   :  { %2912 = vtanh.f32 %v1363_v22  ;;  %v1364_v26 = vadd.f32 %v1360_v25, %v1344_v23  ;;  %v1477_v56 = vrot.slane %v1363_v22, 7 }
0x17fa   :  { %2914 = vtanh.f32 %v1364_v26  ;;  %v1478_v55 = vrot.slane %v1364_v26, 7 }
0x1802   :  { %v2913_v27 = vpop.eup %2912 }
0x1803   :  { %1369 = vrot.lane.b32.xlu1 %v2913_v27, %s3055_s2 }
0x1804   :  { %v2915_v28 = vpop.eup %2914 }
0x1805   :  { %1371 = vrot.lane.b32.xlu0 %v2915_v28, %s3055_s2 }
0x1875   :  { %v1370_v29 = vpop.permute.xlu1 %1369 }
0x1876   :  { %v1375_v20 = vmul.f32 %v2909_v6, %v1370_v29 }
0x1877   :  { %v1372_v30 = vpop.permute.xlu0 %1371 }
0x1878   :  { %v1376_v24 = vmul.f32 %v2911_v12, %v1372_v30 }
0x187a   :  { %v1379_v31 = vrot.slane %v1376_v24, 7 }
0x187c   :  { %v1380_v32 = vsel %vm263_vm2, %v1379_v31, %v1375_v20 }
0x187d   :  { %1381 = vrot.lane.b32.xlu0 %v1380_v32, %s3056_s6 }
0x18ef   :  { %v1382_v33 = vpop.permute.xlu0 %1381 }
0x18f0   :  { %2602 = vmatmul.mubr.msk.f32.vlgmr.msra.gmra.mrb[12].mxu0 %vm132_vm3, %v1382_v33 }
0x18f1   :  { %2738 = vmatpush3.bf16.msra.mxu0 %v3103_v7  ;;  %2623 = vmatprep.mubr.msk.f32.mxu0 %vm3053_vm1, %v3054_v10 }
0x18f2   :  { %2739 = vmatprep.subr.bf16.mxu0 %v3052_v3 }
0x18f5   :  { %2741 = vmatpush3.bf16.msra.mxu0 %v3116_v11 }
0x18f6   :  { %2748 = vmatprep.subr.bf16.mxu0 %v3052_v3 }
0x19c3   :  { %v1451_v34 = vpop.f32.mrb[12].mxu0 }
0x19c4   :  { %v1456_v35 = vrot.slane %v1451_v34, 7  ;;  %v1460_v36 = vadd.f32 %v1451_v34, %v3144_v18  ;;  %v2603_v37 = vpop.f32.mrb[13].mxu0 }
0x19c6   :  { %v1459_v38 = vadd.f32 %v1456_v35, %v3142_v15  ;;  %2916 = vtanh.f32 %v1460_v36  ;;  %v1462_v41 = vsub.f32 0.0, %v1460_v36 }
0x19c8   :  { %2918 = vtanh.f32 %v1459_v38  ;;  %v1461_v42 = vsub.f32 0.0, %v1459_v38  ;;  %v1465_v43 = vmul.f32 1.442695, %v1462_v41 }
0x19ca   :  { %v1463_v44 = vmul.f32 1.442695, %v1461_v42  ;;  %2920 = vpow2.f32 %v1465_v43 }
0x19cc   :  { %2922 = vpow2.f32 %v1463_v44 }
0x19d0   :  { %v2917_v39 = vpop.eup %2916 }
0x19d1   :  { %1487 = vrot.lane.b32.xlu0 %v2917_v39, %s3055_s2 }
0x19d2   :  { %v2919_v40 = vpop.eup %2918 }
0x19d3   :  { %1485 = vrot.lane.b32.xlu1 %v2919_v40, %s3055_s2 }
0x19d4   :  { %v2921_v45 = vpop.eup %2920 }
0x19d5   :  { %v1468_v47 = vadd.f32 1.0, %v2921_v45 }
0x19d6   :  { %v2923_v46 = vpop.eup %2922 }
0x19d7   :  { %v1467_v48 = vadd.f32 1.0, %v2923_v46  ;;  %2924 = vrcp.f32 %v1468_v47 }
0x19d9   :  { %2926 = vrcp.f32 %v1467_v48 }
0x19e1   :  { %v2925_v49 = vpop.eup %2924 }
0x19e2   :  { %v1482_v57 = vmul.f32 %v2925_v49, %v1478_v55 }
0x19e3   :  { %v2927_v52 = vpop.eup %2926 }
0x19e4   :  { %v1481_v60 = vmul.f32 %v2927_v52, %v1477_v56 }
0x1a43   :  { %v1488_v50 = vpop.permute.xlu0 %1487 }
0x1a44   :  { %v1492_v51 = vmul.f32 %v2925_v49, %v1488_v50 }
0x1a45   :  { %v1486_v53 = vpop.permute.xlu1 %1485 }
0x1a46   :  { %v1491_v54 = vmul.f32 %v2927_v52, %v1486_v53  ;;  %1497 = vrot.lane.b32.xlu0 %v1492_v51, %s3055_s2 }
0x1a48   :  { %1495 = vrot.lane.b32.xlu1 %v1491_v54, %s3055_s2 }
0x1ab8   :  { %v1498_v58 = vpop.permute.xlu0 %1497 }
0x1ab9   :  { %v1502_v59 = vadd.f32 %v1498_v58, %v1482_v57 }
0x1aba   :  { %v1496_v61 = vpop.permute.xlu1 %1495 }
0x1abb   :  { %2928 = vtanh.f32 %v1502_v59  ;;  %v1501_v62 = vadd.f32 %v1496_v61, %v1481_v60  ;;  %v1617_v37 = vrot.slane %v1502_v59, 7 }
0x1abd   :  { %2930 = vtanh.f32 %v1501_v62  ;;  %v1616_v36 = vrot.slane %v1501_v62, 7 }
0x1ac5   :  { %v2929_v63 = vpop.eup %2928 }
0x1ac6   :  { %1509 = vrot.lane.b32.xlu0 %v2929_v63, %s3055_s2 }
0x1ac7   :  { %v2931_v0 = vpop.eup %2930 }
0x1ac8   :  { %1507 = vrot.lane.b32.xlu1 %v2931_v0, %s3055_s2 }
0x1b38   :  { %v1510_v1 = vpop.permute.xlu0 %1509 }
0x1b39   :  { %v1514_v5 = vmul.f32 %v2925_v49, %v1510_v1 }
0x1b3a   :  { %v1508_v2 = vpop.permute.xlu1 %1507 }
0x1b3b   :  { %v1513_v4 = vmul.f32 %v2927_v52, %v1508_v2 }
0x1b3d   :  { %v1517_v6 = vrot.slane %v1513_v4, 1 }
0x1b3f   :  { %v1518_v8 = vsel %vm263_vm2, %v1514_v5, %v1517_v6 }
0x1b40   :  { %1519 = vrot.lane.b32.xlu1 %v1518_v8, %s3056_s6 }
0x1bb2   :  { %v1520_v9 = vpop.permute.xlu1 %1519 }
0x1bb3   :  { %2613 = vmatmul.mubr.msk.f32.vlgmr.msra.gmra.mrb[10].mxu1 %vm132_vm3, %v1520_v9 }
0x1bb4   :  { %2744 = vmatpush3.bf16.msra.mxu1 %v3103_v7  ;;  %2634 = vmatprep.mubr.msk.f32.mxu1 %vm3053_vm1, %v3054_v10 }
0x1bb5   :  { %2745 = vmatprep.subr.bf16.mxu1 %v3052_v3 }
0x1bb8   :  { %2747 = vmatpush3.bf16.msra.mxu1 %v3116_v11 }
0x1bb9   :  { %2754 = vmatprep.subr.bf16.mxu1 %v3052_v3 }
0x1c86   :  { %v1589_v12 = vpop.f32.mrb[10].mxu1 }
0x1c87   :  { %v1594_v13 = vrot.slane %v1589_v12, 6  ;;  %v1595_v14 = vrot.slane %v1589_v12, 7  ;;  %v2614_v16 = vpop.f32.mrb[11].mxu1 }
0x1c89   :  { %v1598_v17 = vadd.f32 %v1594_v13, %v3142_v15  ;;  %v1599_v19 = vadd.f32 %v1595_v14, %v3144_v18 }
0x1c8b   :  { %2932 = vtanh.f32 %v1598_v17  ;;  %v1600_v23 = vsub.f32 0.0, %v1598_v17  ;;  %v1601_v25 = vsub.f32 0.0, %v1599_v19 }
0x1c8c   :  { %2934 = vtanh.f32 %v1599_v19 }
0x1c8d   :  { %v1602_v26 = vmul.f32 1.442695, %v1600_v23  ;;  %v1604_v27 = vmul.f32 1.442695, %v1601_v25 }
0x1c8f   :  { %2936 = vpow2.f32 %v1602_v26 }
0x1c90   :  { %2938 = vpow2.f32 %v1604_v27 }
0x1c95   :  { %v2933_v21 = vpop.eup %2932 }
0x1c96   :  { %v2935_v22 = vpop.eup %2934  ;;  %1624 = vrot.lane.b32.xlu0 %v2933_v21, %s3055_s2 }
0x1c97   :  { %1626 = vrot.lane.b32.xlu1 %v2935_v22, %s3055_s2 }
0x1c99   :  { %v2937_v28 = vpop.eup %2936 }
0x1c9a   :  { %v2939_v29 = vpop.eup %2938  ;;  %v1606_v30 = vadd.f32 1.0, %v2937_v28 }
0x1c9b   :  { %v1607_v24 = vadd.f32 1.0, %v2939_v29 }
0x1c9c   :  { %2940 = vrcp.f32 %v1606_v30 }
0x1c9d   :  { %2942 = vrcp.f32 %v1607_v24 }
0x1ca6   :  { %v2941_v20 = vpop.eup %2940 }
0x1ca7   :  { %v2943_v32 = vpop.eup %2942  ;;  %v1620_v38 = vmul.f32 %v2941_v20, %v1616_v36 }
0x1ca8   :  { %v1621_v39 = vmul.f32 %v2943_v32, %v1617_v37 }
0x1d08   :  { %v1625_v31 = vpop.permute.xlu0 %1624 }
0x1d09   :  { %v1627_v33 = vpop.permute.xlu1 %1626  ;;  %v1630_v34 = vmul.f32 %v2941_v20, %v1625_v31 }
0x1d0a   :  { %v1631_v35 = vmul.f32 %v2943_v32, %v1627_v33 }
0x1d0b   :  { %1634 = vrot.lane.b32.xlu0 %v1630_v34, %s3055_s2 }
0x1d0c   :  { %1636 = vrot.lane.b32.xlu1 %v1631_v35, %s3055_s2 }
0x1d7d   :  { %v1635_v40 = vpop.permute.xlu0 %1634 }
0x1d7e   :  { %v1637_v41 = vpop.permute.xlu1 %1636  ;;  %v1640_v42 = vadd.f32 %v1635_v40, %v1620_v38 }
0x1d7f   :  { %v1641_v43 = vadd.f32 %v1637_v41, %v1621_v39 }
0x1d80   :  { %2944 = vtanh.f32 %v1640_v42  ;;  %v1756_v17 = vrot.slane %v1640_v42, 7 }
0x1d81   :  { %2946 = vtanh.f32 %v1641_v43  ;;  %v1757_v19 = vrot.slane %v1641_v43, 7 }
0x1d8a   :  { %v2945_v44 = vpop.eup %2944 }
0x1d8b   :  { %v2947_v45 = vpop.eup %2946  ;;  %1646 = vrot.lane.b32.xlu0 %v2945_v44, %s3055_s2 }
0x1d8c   :  { %1648 = vrot.lane.b32.xlu1 %v2947_v45, %s3055_s2 }
0x1dfd   :  { %v1647_v46 = vpop.permute.xlu0 %1646 }
0x1dfe   :  { %v1649_v47 = vpop.permute.xlu1 %1648  ;;  %v1652_v48 = vmul.f32 %v2941_v20, %v1647_v46 }
0x1dff   :  { %v1653_v49 = vmul.f32 %v2943_v32, %v1649_v47 }
0x1e00   :  { %v1656_v50 = vrot.slane %v1652_v48, 2 }
0x1e01   :  { %v1657_v51 = vrot.slane %v1653_v49, 1 }
0x1e03   :  { %v1658_v52 = vsel %vm263_vm2, %v1657_v51, %v1656_v50 }
0x1e04   :  { %1659 = vrot.lane.b32.xlu0 %v1658_v52, %s3056_s6 }
0x1e76   :  { %v1660_v53 = vpop.permute.xlu0 %1659 }
0x1e77   :  { %2624 = vmatmul.mubr.msk.f32.vlgmr.msra.gmra.mrb[14].mxu0 %vm132_vm3, %v1660_v53 }
0x1e78   :  { %2750 = vmatpush3.bf16.msra.mxu0 %v3103_v7  ;;  %2645 = vmatprep.mubr.msk.f32.mxu0 %vm3053_vm1, %v3054_v10 }
0x1e79   :  { %2751 = vmatprep.subr.bf16.mxu0 %v3052_v3 }
0x1e7c   :  { %2753 = vmatpush3.bf16.msra.mxu0 %v3116_v11 }
0x1e7d   :  { %2760 = vmatprep.subr.bf16.mxu0 %v3052_v3 }
0x1f4a   :  { %v1729_v54 = vpop.f32.mrb[14].mxu0 }
0x1f4b   :  { %v1734_v55 = vrot.slane %v1729_v54, 5  ;;  %v1735_v56 = vrot.slane %v1729_v54, 6  ;;  %v2625_v57 = vpop.f32.mrb[15].mxu0 }
0x1f4d   :  { %v1738_v58 = vadd.f32 %v1734_v55, %v3142_v15  ;;  %v1739_v59 = vadd.f32 %v1735_v56, %v3144_v18 }
0x1f4f   :  { %2948 = vtanh.f32 %v1738_v58  ;;  %v1740_v62 = vsub.f32 0.0, %v1738_v58  ;;  %v1741_v63 = vsub.f32 0.0, %v1739_v59 }
0x1f50   :  { %2950 = vtanh.f32 %v1739_v59 }
0x1f51   :  { %v1742_v0 = vmul.f32 1.442695, %v1740_v62  ;;  %v1744_v1 = vmul.f32 1.442695, %v1741_v63 }
0x1f53   :  { %2952 = vpow2.f32 %v1742_v0 }
0x1f54   :  { %2954 = vpow2.f32 %v1744_v1 }
0x1f59   :  { %v2949_v60 = vpop.eup %2948 }
0x1f5a   :  { %v2951_v61 = vpop.eup %2950  ;;  %1764 = vrot.lane.b32.xlu1 %v2949_v60, %s3055_s2 }
0x1f5b   :  { %1766 = vrot.lane.b32.xlu0 %v2951_v61, %s3055_s2 }
0x1f5d   :  { %v2953_v2 = vpop.eup %2952 }
0x1f5e   :  { %v2955_v4 = vpop.eup %2954  ;;  %v1746_v5 = vadd.f32 1.0, %v2953_v2 }
0x1f5f   :  { %v1747_v6 = vadd.f32 1.0, %v2955_v4 }
0x1f60   :  { %2956 = vrcp.f32 %v1746_v5 }
0x1f61   :  { %2958 = vrcp.f32 %v1747_v6 }
0x1f6a   :  { %v2957_v8 = vpop.eup %2956 }
0x1f6b   :  { %v2959_v12 = vpop.eup %2958  ;;  %v1760_v21 = vmul.f32 %v2957_v8, %v1756_v17 }
0x1f6c   :  { %v1761_v22 = vmul.f32 %v2959_v12, %v1757_v19 }
0x1fcc   :  { %v1765_v9 = vpop.permute.xlu1 %1764 }
0x1fcd   :  { %v1767_v13 = vpop.permute.xlu0 %1766  ;;  %v1770_v14 = vmul.f32 %v2957_v8, %v1765_v9 }
0x1fce   :  { %v1771_v16 = vmul.f32 %v2959_v12, %v1767_v13 }
0x1fcf   :  { %1774 = vrot.lane.b32.xlu1 %v1770_v14, %s3055_s2 }
0x1fd0   :  { %1776 = vrot.lane.b32.xlu0 %v1771_v16, %s3055_s2 }
0x2041   :  { %v1775_v23 = vpop.permute.xlu1 %1774 }
0x2042   :  { %v1777_v25 = vpop.permute.xlu0 %1776  ;;  %v1780_v26 = vadd.f32 %v1775_v23, %v1760_v21 }
0x2043   :  { %v1781_v27 = vadd.f32 %v1777_v25, %v1761_v22 }
0x2044   :  { %2960 = vtanh.f32 %v1780_v26  ;;  %v1896_v58 = vrot.slane %v1780_v26, 7 }
0x2045   :  { %2962 = vtanh.f32 %v1781_v27  ;;  %v1897_v59 = vrot.slane %v1781_v27, 7 }
0x204e   :  { %v2961_v28 = vpop.eup %2960 }
0x204f   :  { %v2963_v29 = vpop.eup %2962  ;;  %1786 = vrot.lane.b32.xlu1 %v2961_v28, %s3055_s2 }
0x2050   :  { %1788 = vrot.lane.b32.xlu0 %v2963_v29, %s3055_s2 }
0x20c1   :  { %v1787_v30 = vpop.permute.xlu1 %1786 }
0x20c2   :  { %v1789_v24 = vpop.permute.xlu0 %1788  ;;  %v1792_v20 = vmul.f32 %v2957_v8, %v1787_v30 }
0x20c3   :  { %v1793_v31 = vmul.f32 %v2959_v12, %v1789_v24 }
0x20c4   :  { %v1796_v32 = vrot.slane %v1792_v20, 3 }
0x20c5   :  { %v1797_v33 = vrot.slane %v1793_v31, 2 }
0x20c7   :  { %v1798_v34 = vsel %vm263_vm2, %v1797_v33, %v1796_v32 }
0x20c8   :  { %1799 = vrot.lane.b32.xlu1 %v1798_v34, %s3056_s6 }
0x213a   :  { %v1800_v35 = vpop.permute.xlu1 %1799 }
0x213b   :  { %2635 = vmatmul.mubr.msk.f32.vlgmr.msra.gmra.mrb[12].mxu1 %vm132_vm3, %v1800_v35 }
0x213c   :  { %2756 = vmatpush3.bf16.msra.mxu1 %v3103_v7  ;;  %2656 = vmatprep.mubr.msk.f32.mxu1 %vm3053_vm1, %v3054_v10 }
0x213d   :  { %2757 = vmatprep.subr.bf16.mxu1 %v3052_v3 }
0x2140   :  { %2759 = vmatpush3.bf16.msra.mxu1 %v3116_v11 }
0x220e   :  { %v1869_v36 = vpop.f32.mrb[12].mxu1 }
0x220f   :  { %v1874_v37 = vrot.slane %v1869_v36, 4  ;;  %v1875_v38 = vrot.slane %v1869_v36, 5  ;;  %v2636_v39 = vpop.f32.mrb[13].mxu1 }
0x2211   :  { %v1878_v40 = vadd.f32 %v1874_v37, %v3142_v15  ;;  %v1879_v41 = vadd.f32 %v1875_v38, %v3144_v18 }
0x2213   :  { %2964 = vtanh.f32 %v1878_v40  ;;  %v1880_v44 = vsub.f32 0.0, %v1878_v40  ;;  %v1881_v45 = vsub.f32 0.0, %v1879_v41 }
0x2214   :  { %2966 = vtanh.f32 %v1879_v41 }
0x2215   :  { %v1882_v46 = vmul.f32 1.442695, %v1880_v44  ;;  %v1884_v47 = vmul.f32 1.442695, %v1881_v45 }
0x2217   :  { %2968 = vpow2.f32 %v1882_v46 }
0x2218   :  { %2970 = vpow2.f32 %v1884_v47 }
0x221d   :  { %v2965_v42 = vpop.eup %2964 }
0x221e   :  { %v2967_v43 = vpop.eup %2966  ;;  %1904 = vrot.lane.b32.xlu0 %v2965_v42, %s3055_s2 }
0x221f   :  { %1906 = vrot.lane.b32.xlu1 %v2967_v43, %s3055_s2 }
0x2221   :  { %v2969_v48 = vpop.eup %2968 }
0x2222   :  { %v2971_v49 = vpop.eup %2970  ;;  %v1886_v50 = vadd.f32 1.0, %v2969_v48 }
0x2223   :  { %v1887_v51 = vadd.f32 1.0, %v2971_v49 }
0x2224   :  { %2972 = vrcp.f32 %v1886_v50 }
0x2225   :  { %2974 = vrcp.f32 %v1887_v51 }
0x222e   :  { %v2973_v52 = vpop.eup %2972 }
0x222f   :  { %v2975_v54 = vpop.eup %2974  ;;  %v1900_v60 = vmul.f32 %v2973_v52, %v1896_v58 }
0x2230   :  { %v1901_v61 = vmul.f32 %v2975_v54, %v1897_v59 }
0x2290   :  { %v1905_v53 = vpop.permute.xlu0 %1904 }
0x2291   :  { %v1907_v55 = vpop.permute.xlu1 %1906  ;;  %v1910_v56 = vmul.f32 %v2973_v52, %v1905_v53 }
0x2292   :  { %v1911_v57 = vmul.f32 %v2975_v54, %v1907_v55 }
0x2293   :  { %1914 = vrot.lane.b32.xlu0 %v1910_v56, %s3055_s2 }
0x2294   :  { %1916 = vrot.lane.b32.xlu1 %v1911_v57, %s3055_s2 }
0x2305   :  { %v1915_v62 = vpop.permute.xlu0 %1914 }
0x2306   :  { %v1917_v63 = vpop.permute.xlu1 %1916  ;;  %v1920_v0 = vadd.f32 %v1915_v62, %v1900_v60 }
0x2307   :  { %v1921_v1 = vadd.f32 %v1917_v63, %v1901_v61 }
0x2308   :  { %2976 = vtanh.f32 %v1920_v0  ;;  %v2036_v36 = vrot.slane %v1920_v0, 7 }
0x2309   :  { %2978 = vtanh.f32 %v1921_v1  ;;  %v2037_v37 = vrot.slane %v1921_v1, 7 }
0x2312   :  { %v2977_v2 = vpop.eup %2976 }
0x2313   :  { %v2979_v4 = vpop.eup %2978  ;;  %1926 = vrot.lane.b32.xlu0 %v2977_v2, %s3055_s2 }
0x2314   :  { %1928 = vrot.lane.b32.xlu1 %v2979_v4, %s3055_s2 }
0x2385   :  { %v1927_v5 = vpop.permute.xlu0 %1926 }
0x2386   :  { %v1929_v6 = vpop.permute.xlu1 %1928  ;;  %v1932_v8 = vmul.f32 %v2973_v52, %v1927_v5 }
0x2387   :  { %v1933_v9 = vmul.f32 %v2975_v54, %v1929_v6 }
0x2388   :  { %v1936_v12 = vrot.slane %v1932_v8, 4 }
0x2389   :  { %v1937_v13 = vrot.slane %v1933_v9, 3 }
0x238b   :  { %v1938_v14 = vsel %vm263_vm2, %v1937_v13, %v1936_v12 }
0x238c   :  { %1939 = vrot.lane.b32.xlu0 %v1938_v14, %s3056_s6 }
0x23fe   :  { %v1940_v16 = vpop.permute.xlu0 %1939 }
0x23ff   :  { %2646 = vmatmul.mubr.msk.f32.vlgmr.msra.gmra.mrb[16].mxu0 %vm132_vm3, %v1940_v16 }
0x2400   :  { %2762 = vmatpush3.bf16.msra.mxu0 %v3103_v7  ;;  %2667 = vmatprep.mubr.msk.f32.mxu0 %vm3053_vm1, %v3054_v10 }
0x2401   :  { %2763 = vmatprep.subr.bf16.mxu0 %v3052_v3 }
0x2404   :  { %2765 = vmatpush3.bf16.msra.mxu0 %v3116_v11 }
0x24d2   :  { %v2009_v17 = vpop.f32.mrb[16].mxu0 }
0x24d3   :  { %v2014_v19 = vrot.slane %v2009_v17, 3  ;;  %v2015_v21 = vrot.slane %v2009_v17, 4  ;;  %v2647_v22 = vpop.f32.mrb[17].mxu0 }
0x24d5   :  { %v2018_v23 = vadd.f32 %v2014_v19, %v3142_v15  ;;  %v2019_v25 = vadd.f32 %v2015_v21, %v3144_v18 }
0x24d7   :  { %2980 = vtanh.f32 %v2018_v23  ;;  %v2020_v7 = vsub.f32 0.0, %v2018_v23  ;;  %v2021_v3 = vsub.f32 0.0, %v2019_v25 }
0x24d8   :  { %2982 = vtanh.f32 %v2019_v25 }
0x24d9   :  { %v2022_v10 = vmul.f32 1.442695, %v2020_v7  ;;  %v2024_v11 = vmul.f32 1.442695, %v2021_v3 }
0x24db   :  { %2984 = vpow2.f32 %v2022_v10 }
0x24dc   :  { %2986 = vpow2.f32 %v2024_v11 }
0x24e1   :  { %v2981_v26 = vpop.eup %2980 }
0x24e2   :  { %v2983_v27 = vpop.eup %2982  ;;  %2044 = vrot.lane.b32.xlu1 %v2981_v26, %s3055_s2 }
0x24e3   :  { %2046 = vrot.lane.b32.xlu0 %v2983_v27, %s3055_s2 }
0x24e5   :  { %v2985_v28 = vpop.eup %2984 }
0x24e6   :  { %v2987_v29 = vpop.eup %2986  ;;  %v2026_v30 = vadd.f32 1.0, %v2985_v28 }
0x24e7   :  { %v2027_v24 = vadd.f32 1.0, %v2987_v29 }
0x24e8   :  { %2988 = vrcp.f32 %v2026_v30 }
0x24e9   :  { %2990 = vrcp.f32 %v2027_v24 }
0x24f2   :  { %v2989_v20 = vpop.eup %2988 }
0x24f3   :  { %v2991_v32 = vpop.eup %2990  ;;  %v2040_v38 = vmul.f32 %v2989_v20, %v2036_v36 }
0x24f4   :  { %v2041_v39 = vmul.f32 %v2991_v32, %v2037_v37 }
0x2554   :  { %v2045_v31 = vpop.permute.xlu1 %2044 }
0x2555   :  { %v2047_v33 = vpop.permute.xlu0 %2046  ;;  %v2050_v34 = vmul.f32 %v2989_v20, %v2045_v31 }
0x2556   :  { %v2051_v35 = vmul.f32 %v2991_v32, %v2047_v33 }
0x2557   :  { %2054 = vrot.lane.b32.xlu1 %v2050_v34, %s3055_s2 }
0x2558   :  { %2056 = vrot.lane.b32.xlu0 %v2051_v35, %s3055_s2 }
0x25c9   :  { %v2055_v40 = vpop.permute.xlu1 %2054 }
0x25ca   :  { %v2057_v41 = vpop.permute.xlu0 %2056  ;;  %v2060_v42 = vadd.f32 %v2055_v40, %v2040_v38 }
0x25cb   :  { %v2061_v43 = vadd.f32 %v2057_v41, %v2041_v39 }
0x25cc   :  { %2992 = vtanh.f32 %v2060_v42  ;;  %v2176_v17 = vrot.slane %v2060_v42, 7 }
0x25cd   :  { %2994 = vtanh.f32 %v2061_v43  ;;  %v2177_v19 = vrot.slane %v2061_v43, 7 }
0x25d6   :  { %v2993_v44 = vpop.eup %2992 }
0x25d7   :  { %v2995_v45 = vpop.eup %2994  ;;  %2066 = vrot.lane.b32.xlu1 %v2993_v44, %s3055_s2 }
0x25d8   :  { %2068 = vrot.lane.b32.xlu0 %v2995_v45, %s3055_s2 }
0x2649   :  { %v2067_v46 = vpop.permute.xlu1 %2066 }
0x264a   :  { %v2069_v47 = vpop.permute.xlu0 %2068  ;;  %v2072_v48 = vmul.f32 %v2989_v20, %v2067_v46 }
0x264b   :  { %v2073_v49 = vmul.f32 %v2991_v32, %v2069_v47 }
0x264c   :  { %v2076_v50 = vrot.slane %v2072_v48, 5 }
0x264d   :  { %v2077_v51 = vrot.slane %v2073_v49, 4 }
0x264f   :  { %v2078_v52 = vsel %vm263_vm2, %v2077_v51, %v2076_v50 }
0x2650   :  { %2079 = vrot.lane.b32.xlu1 %v2078_v52, %s3056_s6 }
0x26c2   :  { %v2080_v53 = vpop.permute.xlu1 %2079 }
0x26c3   :  { %2657 = vmatmul.mubr.msk.f32.vlgmr.msra.gmra.mrb[14].mxu1 %vm132_vm3, %v2080_v53 }
0x2796   :  { %v2149_v54 = vpop.f32.mrb[14].mxu1 }
0x2797   :  { %v2154_v55 = vrot.slane %v2149_v54, 2  ;;  %v2155_v56 = vrot.slane %v2149_v54, 3  ;;  %v2658_v57 = vpop.f32.mrb[15].mxu1 }
0x2799   :  { %v2158_v58 = vadd.f32 %v2154_v55, %v3142_v15  ;;  %v2159_v59 = vadd.f32 %v2155_v56, %v3144_v18 }
0x279b   :  { %2996 = vtanh.f32 %v2158_v58  ;;  %v2160_v62 = vsub.f32 0.0, %v2158_v58  ;;  %v2161_v63 = vsub.f32 0.0, %v2159_v59 }
0x279c   :  { %2998 = vtanh.f32 %v2159_v59 }
0x279d   :  { %v2162_v0 = vmul.f32 1.442695, %v2160_v62  ;;  %v2164_v1 = vmul.f32 1.442695, %v2161_v63 }
0x279f   :  { %3000 = vpow2.f32 %v2162_v0 }
0x27a0   :  { %3002 = vpow2.f32 %v2164_v1 }
0x27a5   :  { %v2997_v60 = vpop.eup %2996 }
0x27a6   :  { %v2999_v61 = vpop.eup %2998  ;;  %2184 = vrot.lane.b32.xlu0 %v2997_v60, %s3055_s2 }
0x27a7   :  { %2186 = vrot.lane.b32.xlu1 %v2999_v61, %s3055_s2 }
0x27a9   :  { %v3001_v2 = vpop.eup %3000 }
0x27aa   :  { %v3003_v4 = vpop.eup %3002  ;;  %v2166_v5 = vadd.f32 1.0, %v3001_v2 }
0x27ab   :  { %v2167_v6 = vadd.f32 1.0, %v3003_v4 }
0x27ac   :  { %3004 = vrcp.f32 %v2166_v5 }
0x27ad   :  { %3006 = vrcp.f32 %v2167_v6 }
0x27b6   :  { %v3005_v8 = vpop.eup %3004 }
0x27b7   :  { %v3007_v12 = vpop.eup %3006  ;;  %v2180_v21 = vmul.f32 %v3005_v8, %v2176_v17 }
0x27b8   :  { %v2181_v22 = vmul.f32 %v3007_v12, %v2177_v19 }
0x2818   :  { %v2185_v9 = vpop.permute.xlu0 %2184 }
0x2819   :  { %v2187_v13 = vpop.permute.xlu1 %2186  ;;  %v2190_v14 = vmul.f32 %v3005_v8, %v2185_v9 }
0x281a   :  { %v2191_v16 = vmul.f32 %v3007_v12, %v2187_v13 }
0x281b   :  { %2194 = vrot.lane.b32.xlu0 %v2190_v14, %s3055_s2 }
0x281c   :  { %2196 = vrot.lane.b32.xlu1 %v2191_v16, %s3055_s2 }
0x288d   :  { %v2195_v23 = vpop.permute.xlu0 %2194 }
0x288e   :  { %v2197_v25 = vpop.permute.xlu1 %2196  ;;  %v2200_v26 = vadd.f32 %v2195_v23, %v2180_v21 }
0x288f   :  { %v2201_v27 = vadd.f32 %v2197_v25, %v2181_v22 }
0x2890   :  { %3008 = vtanh.f32 %v2200_v26  ;;  %v2316_v52 = vrot.slane %v2200_v26, 7 }
0x2891   :  { %3010 = vtanh.f32 %v2201_v27  ;;  %v2317_v53 = vrot.slane %v2201_v27, 7 }
0x289a   :  { %v3009_v7 = vpop.eup %3008 }
0x289b   :  { %v3011_v3 = vpop.eup %3010  ;;  %2206 = vrot.lane.b32.xlu0 %v3009_v7, %s3055_s2 }
0x289c   :  { %2208 = vrot.lane.b32.xlu1 %v3011_v3, %s3055_s2 }
0x290d   :  { %v2207_v10 = vpop.permute.xlu0 %2206 }
0x290e   :  { %v2209_v11 = vpop.permute.xlu1 %2208  ;;  %v2212_v28 = vmul.f32 %v3005_v8, %v2207_v10 }
0x290f   :  { %v2213_v29 = vmul.f32 %v3007_v12, %v2209_v11 }
0x2910   :  { %v2216_v30 = vrot.slane %v2212_v28, 6 }
0x2911   :  { %v2217_v24 = vrot.slane %v2213_v29, 5 }
0x2913   :  { %v2218_v20 = vsel %vm263_vm2, %v2217_v24, %v2216_v30 }
0x2914   :  { %2219 = vrot.lane.b32.xlu0 %v2218_v20, %s3056_s6 }
0x2986   :  { %v2220_v31 = vpop.permute.xlu0 %2219 }
0x2987   :  { %2668 = vmatmul.mubr.msk.f32.vlgmr.msra.gmra.mrb[18].mxu0 %vm132_vm3, %v2220_v31 }
0x2a5a   :  { %v2289_v32 = vpop.f32.mrb[18].mxu0 }
0x2a5b   :  { %v2294_v33 = vrot.slane %v2289_v32, 1  ;;  %v2295_v34 = vrot.slane %v2289_v32, 2  ;;  %v2669_v35 = vpop.f32.mrb[19].mxu0 }
0x2a5d   :  { %v2298_v36 = vadd.f32 %v2294_v33, %v3142_v15  ;;  %v2299_v37 = vadd.f32 %v2295_v34, %v3144_v18 }
0x2a5f   :  { %3012 = vtanh.f32 %v2298_v36  ;;  %v2300_v40 = vsub.f32 0.0, %v2298_v36  ;;  %v2301_v41 = vsub.f32 0.0, %v2299_v37 }
0x2a60   :  { %3014 = vtanh.f32 %v2299_v37 }
0x2a61   :  { %v2302_v42 = vmul.f32 1.442695, %v2300_v40  ;;  %v2304_v43 = vmul.f32 1.442695, %v2301_v41 }
0x2a63   :  { %3016 = vpow2.f32 %v2302_v42 }
0x2a64   :  { %3018 = vpow2.f32 %v2304_v43 }
0x2a69   :  { %v3013_v38 = vpop.eup %3012 }
0x2a6a   :  { %v3015_v39 = vpop.eup %3014  ;;  %2324 = vrot.lane.b32.xlu0 %v3013_v38, %s3055_s2 }
0x2a6b   :  { %2326 = vrot.lane.b32.xlu1 %v3015_v39, %s3055_s2 }
0x2a6d   :  { %v3017_v44 = vpop.eup %3016 }
0x2a6e   :  { %v3019_v45 = vpop.eup %3018  ;;  %v2306_v46 = vadd.f32 1.0, %v3017_v44 }
0x2a6f   :  { %v2307_v15 = vadd.f32 1.0, %v3019_v45 }
0x2a70   :  { %3020 = vrcp.f32 %v2306_v46 }
0x2a71   :  { %3022 = vrcp.f32 %v2307_v15 }
0x2a7a   :  { %v3021_v18 = vpop.eup %3020 }
0x2a7b   :  { %v3023_v48 = vpop.eup %3022  ;;  %v2320_v54 = vmul.f32 %v3021_v18, %v2316_v52 }
0x2a7c   :  { %v2321_v55 = vmul.f32 %v3023_v48, %v2317_v53 }
0x2adc   :  { %v2325_v47 = vpop.permute.xlu0 %2324 }
0x2add   :  { %v2327_v49 = vpop.permute.xlu1 %2326  ;;  %v2330_v50 = vmul.f32 %v3021_v18, %v2325_v47 }
0x2ade   :  { %v2331_v51 = vmul.f32 %v3023_v48, %v2327_v49 }
0x2adf   :  { %2334 = vrot.lane.b32.xlu0 %v2330_v50, %s3055_s2 }
0x2ae0   :  { %2336 = vrot.lane.b32.xlu1 %v2331_v51, %s3055_s2 }
0x2b51   :  { %v2335_v56 = vpop.permute.xlu0 %2334 }
0x2b52   :  { %v2337_v57 = vpop.permute.xlu1 %2336  ;;  %v2340_v58 = vadd.f32 %v2335_v56, %v2320_v54 }
0x2b53   :  { %v2341_v59 = vadd.f32 %v2337_v57, %v2321_v55 }
0x2b54   :  { %3024 = vtanh.f32 %v2340_v58 }
0x2b55   :  { %3026 = vtanh.f32 %v2341_v59 }
0x2b5e   :  { %v3025_v60 = vpop.eup %3024 }
0x2b5f   :  { %v3027_v61 = vpop.eup %3026  ;;  %2346 = vrot.lane.b32.xlu0 %v3025_v60, %s3055_s2 }
0x2b60   :  { %2348 = vrot.lane.b32.xlu1 %v3027_v61, %s3055_s2 }
0x2bd1   :  { %v2347_v62 = vpop.permute.xlu0 %2346 }
0x2bd2   :  { %v2349_v63 = vpop.permute.xlu1 %2348  ;;  %v2352_v0 = vmul.f32 %v3021_v18, %v2347_v62 }
0x2bd3   :  { %v2353_v1 = vmul.f32 %v3023_v48, %v2349_v63 }
0x2bd4   :  { %2357 = vrot.lane.b32.xlu1 %v2352_v0, %s3056_s6 }
0x2bd5   :  { %v2356_v2 = vrot.slane %v2353_v1, 7 }
0x2bd7   :  { %2359 = vrot.lane.b32.xlu0 %v2356_v2, %s3056_s6 }
0x2c46   :  { %v2358_v4 = vpop.permute.xlu1 %2357 }
0x2c47   :  { %2364 = vst.msk [vmem:[#allocation2 - $0x7] sm:$0x80] %vm2363_vm4, %v2358_v4 }
0x2c49   :  { %v2360_v5 = vpop.permute.xlu0 %2359 }
0x2c4a   :  { %2366 = vst.msk [vmem:[#allocation2 + $0x1] sm:$0x1] %vm2365_vm5, %v2360_v5 }
0x2c4b   :  { %3039 = shalt.err (!%p3036_p4)
}
0x2c4c   :  { %s3040_s12 = scalar_lea.hbm %s3417_s4, 32 }
0x2c4d   :  { %p3041_p5 = scmp.ne.s32.totalorder %s3417_s4, %s3040_s12  ;;  %p3044_p6 = scmp.lt.u32.totalorder %s3040_s12, %s3417_s4 }
0x2c4f   :  { %p3046_p7 = pnand %p3044_p6, %p3041_p5 }
0x2c51   :  { %3049 = shalt.err (!%p3046_p7)
}
0x2c52   :  { %2376 = dma.vmem_to_hbm [thread:$0]  %s2374_s8, 32, %s3417_s4, [#allocation3]  }
0x2c53   :  { %3050 = dma.done.wait [#allocation3], 32  }
0x2c54   :  { %3051 = vsyncadd [#allocation3], 4294967264 }
0x2c55   :  { %2380 = vsyncpa [#allocation3], 1 }

</bundles_post_ra>
